<compile_context>
chip_gen: v5e
topology: v5e:2x2
jax: 0.10.0
libtpu: 0.0.40
codegen_flags: <defaults>
</compile_context>

<pallas_src>
import functools

import jax
import jax.numpy as jnp
from jax.experimental import pallas as pl
from jax.experimental.pallas import tpu as pltpu

BN_EPS = 1e-5
VMEM_LIMIT = 32 * 1024 * 1024  # safe on v5e/v6e/v7x (<= scoped defaults / physical)

# EfficientNet-B0 stage configuration: (expand_ratio, kernel, stride, out_ch, repeats)
STAGE_CFG = [
    (1, 3, 1, 16, 1),
    (6, 3, 2, 24, 2),
    (6, 5, 2, 40, 2),
    (6, 3, 2, 80, 3),
    (6, 5, 1, 112, 3),
    (6, 5, 2, 192, 4),
    (6, 3, 1, 320, 1),
]

_VMEM_SPEC = pl.BlockSpec(memory_space=pltpu.MemorySpace.VMEM)


def _row_tile(m, target=512):
    """Largest row-tile <= target that divides m (multiple of 8 when tiling)."""
    if m <= target:
        return m
    for t in range(target, 7, -8):
        if m % t == 0:
            return t
    return m


# ----------------------------------------------------------------------------- kernels
def _mm_kernel(x_ref, w_ref, s_ref, b_ref, o_ref, *, act):
    """Y = act((X @ W) * scale + bias) -- 1x1 conv / stem / head with folded BN."""
    y = jnp.dot(x_ref[...].astype(jnp.bfloat16), w_ref[...],
                preferred_element_type=jnp.float32)
    y = y * s_ref[...] + b_ref[...]
    if act == "silu":
        y = y * jax.nn.sigmoid(y)
    o_ref[...] = y.astype(o_ref.dtype)


def _dw_kernel(*args, K, stride):
    """Depthwise KxK conv (stride baked in via phase-decomposed inputs) + folded BN
    + SiLU.  Second output: SE global-average pool of the activated result."""
    nph = stride * stride
    x_refs = args[:nph]
    w_ref, s_ref, b_ref, o_ref, p_ref = args[nph:]
    Ho, Wo, C = o_ref.shape[1], o_ref.shape[2], o_ref.shape[3]

    xs = [r[...].astype(jnp.float32) for r in x_refs]   # phase grids, f32
    w = w_ref[...]                                      # (K, K, C) f32
    acc = jnp.zeros((1, Ho, Wo, C), jnp.float32)
    for kh in range(K):
        ph, qh = kh % stride, kh // stride
        for kw in range(K):
            pw, qw = kw % stride, kw // stride
            xph = xs[ph * stride + pw]
            acc = acc + xph[:, qh:qh + Ho, qw:qw + Wo, :] * w[kh:kh + 1, kw:kw + 1, :]
    y = acc * s_ref[...] + b_ref[...]
    y = y * jax.nn.sigmoid(y)                           # SiLU (f32)
    o_ref[...] = y.astype(o_ref.dtype)
    p_ref[0] = jnp.mean(y, axis=(1, 2))                 # (1, C) f32 -- SE pool


def _proj_kernel(x_ref, p_ref, w1_ref, b1_ref, w2_ref, b2_ref,
                 w_ref, s_ref, b_ref, *rest, has_res):
    """Fused MBConv tail: SE gate (2 tiny FCs from the pooled vector) * x, then
    1x1 projection + folded BN (+ residual)."""
    if has_res:
        r_ref, o_ref = rest
    else:
        (o_ref,) = rest

    p = p_ref[0]                                        # (1, Cmid) f32
    h = jnp.dot(p.astype(jnp.bfloat16), w1_ref[...],
                preferred_element_type=jnp.float32) + b1_ref[...]
    h = h * jax.nn.sigmoid(h)                           # SiLU
    g = jnp.dot(h.astype(jnp.bfloat16), w2_ref[...],
                preferred_element_type=jnp.float32) + b2_ref[...]
    g = jax.nn.sigmoid(g)                               # (1, Cmid) channel gate

    x = x_ref[0].astype(jnp.float32) * g                # (tm, Cmid)
    y = jnp.dot(x.astype(jnp.bfloat16), w_ref[...],
                preferred_element_type=jnp.float32)
    y = y * s_ref[...] + b_ref[...]
    if has_res:
        y = y + r_ref[0].astype(jnp.float32)
    o_ref[0] = y.astype(o_ref.dtype)


def _pool_fc_kernel(x_ref, w_ref, b_ref, o_ref):
    """Global average pool over spatial + classifier linear (lane-dense padded out)."""
    x = x_ref[...].astype(jnp.float32)                  # (N, HW, C)
    p = jnp.mean(x, axis=1)                             # (N, C)
    y = jnp.dot(p.astype(jnp.bfloat16), w_ref[...],
                preferred_element_type=jnp.float32) + b_ref[...]
    o_ref[...] = y


# ----------------------------------------------------------------------------- wrappers
def matmul_bn_act(x, w, scale, bias, act="none", out_dtype=jnp.bfloat16):
    M, K = x.shape
    Nout = w.shape[1]
    tm = _row_tile(M)
    kern = functools.partial(_mm_kernel, act=act)
    return pl.pallas_call(
        kern,
        out_shape=jax.ShapeDtypeStruct((M, Nout), out_dtype),
        grid=(M // tm,),
        in_specs=[
            pl.BlockSpec((tm, K), lambda i: (i, 0)),
            pl.BlockSpec((K, Nout), lambda i: (0, 0)),
            pl.BlockSpec((1, Nout), lambda i: (0, 0)),
            pl.BlockSpec((1, Nout), lambda i: (0, 0)),
        ],
        out_specs=pl.BlockSpec((tm, Nout), lambda i: (i, 0)),
        compiler_params=pltpu.CompilerParams(
            dimension_semantics=("parallel",),
            vmem_limit_bytes=VMEM_LIMIT),
    )(x, w, scale.reshape(1, Nout), bias.reshape(1, Nout))


def conv1x1_bn_act(x, w, scale, bias, act="none"):
    N, H, W, C = x.shape
    Cout = w.shape[1]
    y = matmul_bn_act(x.reshape(N * H * W, C), w, scale, bias, act)
    return y.reshape(N, H, W, Cout)


def depthwise_bn_silu_pool(x, w, scale, bias, stride):
    """Depthwise conv + BN + SiLU; also returns SE global-pooled means (N, 1, C)."""
    N, H, W, C = x.shape
    K = w.shape[0]
    pad = (K - 1) // 2
    xp = jnp.pad(x, ((0, 0), (pad, pad), (pad, pad), (0, 0)))
    Hp, Wp = H + 2 * pad, W + 2 * pad
    Ho = (Hp - K) // stride + 1
    Wo = (Wp - K) // stride + 1

    # Phase-decompose the padded input (glue) so stride>1 only reads / computes the
    # strided output positions -- matches PyTorch strided conv with padding=(K-1)//2.
    phases, phase_specs = [], []
    for ph in range(stride):
        rh = Ho + max(kh // stride for kh in range(ph, K, stride))
        for pw in range(stride):
            rw = Wo + max(kw // stride for kw in range(pw, K, stride))
            phases.append(xp[:, ph::stride, pw::stride, :][:, :rh, :rw, :])
            phase_specs.append(pl.BlockSpec((1, rh, rw, C), lambda n: (n, 0, 0, 0)))

    kern = functools.partial(_dw_kernel, K=K, stride=stride)
    out, pooled = pl.pallas_call(
        kern,
        out_shape=(jax.ShapeDtypeStruct((N, Ho, Wo, C), jnp.bfloat16),
                   jax.ShapeDtypeStruct((N, 1, C), jnp.float32)),
        grid=(N,),
        in_specs=phase_specs + [
            pl.BlockSpec((K, K, C), lambda n: (0, 0, 0)),
            pl.BlockSpec((1, 1, 1, C), lambda n: (0, 0, 0, 0)),
            pl.BlockSpec((1, 1, 1, C), lambda n: (0, 0, 0, 0)),
        ],
        out_specs=(pl.BlockSpec((1, Ho, Wo, C), lambda n: (n, 0, 0, 0)),
                   pl.BlockSpec((1, 1, C), lambda n: (n, 0, 0))),
        compiler_params=pltpu.CompilerParams(
            dimension_semantics=("parallel",),
            vmem_limit_bytes=VMEM_LIMIT),
    )(*phases, w, scale.reshape(1, 1, 1, C), bias.reshape(1, 1, 1, C))
    return out, pooled


def se_project(h, pooled, bp, residual):
    """Fused SE gate + 1x1 projection + folded BN (+ residual), gridded over (N, HW)."""
    N, Ho, Wo, Cmid = h.shape
    Cout = bp["pw_w"].shape[1]
    rd = bp["se_w1"].shape[1]
    HW = Ho * Wo
    tm = _row_tile(HW)
    has_res = residual is not None

    in_specs = [
        pl.BlockSpec((1, tm, Cmid), lambda n, i: (n, i, 0)),   # x tile
        pl.BlockSpec((1, 1, Cmid), lambda n, i: (n, 0, 0)),    # pooled
        pl.BlockSpec((Cmid, rd), lambda n, i: (0, 0)),         # se_w1
        pl.BlockSpec((1, rd), lambda n, i: (0, 0)),            # se_b1
        pl.BlockSpec((rd, Cmid), lambda n, i: (0, 0)),         # se_w2
        pl.BlockSpec((1, Cmid), lambda n, i: (0, 0)),          # se_b2
        pl.BlockSpec((Cmid, Cout), lambda n, i: (0, 0)),       # pw_w
        pl.BlockSpec((1, Cout), lambda n, i: (0, 0)),          # bn scale
        pl.BlockSpec((1, Cout), lambda n, i: (0, 0)),          # bn bias
    ]
    args = [h.reshape(N, HW, Cmid), pooled, bp["se_w1"], bp["se_b1"].reshape(1, rd),
            bp["se_w2"], bp["se_b2"].reshape(1, Cmid), bp["pw_w"],
            bp["pw_s"].reshape(1, Cout), bp["pw_b"].reshape(1, Cout)]
    if has_res:
        in_specs.append(pl.BlockSpec((1, tm, Cout), lambda n, i: (n, i, 0)))
        args.append(residual.reshape(N, HW, Cout))

    kern = functools.partial(_proj_kernel, has_res=has_res)
    y = pl.pallas_call(
        kern,
        out_shape=jax.ShapeDtypeStruct((N, HW, Cout), jnp.bfloat16),
        grid=(N, HW // tm),
        in_specs=in_specs,
        out_specs=pl.BlockSpec((1, tm, Cout), lambda n, i: (n, i, 0)),
        compiler_params=pltpu.CompilerParams(
            dimension_semantics=("parallel", "parallel"),
            vmem_limit_bytes=VMEM_LIMIT),
    )(*args)
    return y.reshape(N, Ho, Wo, Cout)


def pool_classifier(x, w, b):
    """x: (N, HW, 1280); w padded to (1280, 128); logits sliced to 88 in glue."""
    N = x.shape[0]
    ncls = w.shape[1]
    return pl.pallas_call(
        _pool_fc_kernel,
        out_shape=jax.ShapeDtypeStruct((N, ncls), jnp.float32),
        in_specs=[_VMEM_SPEC] * 3,
        out_specs=_VMEM_SPEC,
    )(x, w, b.reshape(1, ncls))


def im2col(x, K, stride, pad):
    """Glue: extract KxK patches for the stem conv (fed to the Pallas matmul)."""
    N, H, W, C = x.shape
    xp = jnp.pad(x, ((0, 0), (pad, pad), (pad, pad), (0, 0)))
    Ho = (H + 2 * pad - K) // stride + 1
    Wo = (W + 2 * pad - K) // stride + 1
    cols = []
    for kh in range(K):
        for kw in range(K):
            cols.append(xp[:, kh:kh + Ho * stride:stride, kw:kw + Wo * stride:stride, :])
    return jnp.concatenate(cols, axis=-1), Ho, Wo


# ----------------------------------------------------------------------------- params
class _KeyGen:
    def __init__(self, key):
        self._key = key

    def __call__(self):
        self._key, sub = jax.random.split(self._key)
        return sub


def _bn_fold(kg, c):
    gamma = 1.0 + 0.1 * jax.random.normal(kg(), (c,), jnp.float32)
    beta = 0.1 * jax.random.normal(kg(), (c,), jnp.float32)
    mean = jnp.zeros((c,), jnp.float32)
    var = jnp.ones((c,), jnp.float32)
    scale = gamma / jnp.sqrt(var + BN_EPS)
    bias = beta - mean * scale
    return scale, bias


def init_params(key):
    kg = _KeyGen(key)

    def conv_w(shape, fan_in, dtype=jnp.bfloat16):
        w = jax.random.normal(kg(), shape, jnp.float32) * (2.0 / fan_in) ** 0.5
        return w.astype(dtype)

    params = {}
    # stem: 3x3 stride-2 conv, 3 -> 32 (im2col layout (kh,kw,Cin) fastest-C; padded 27->32)
    s, b = _bn_fold(kg, 32)
    stem_w = jax.random.normal(kg(), (27, 32), jnp.float32) * (2.0 / 27.0) ** 0.5
    stem_w = jnp.pad(stem_w, ((0, 5), (0, 0))).astype(jnp.bfloat16)
    params["stem"] = dict(w=stem_w, s=s, b=b)

    blocks = []
    in_ch = 32
    for (exp, k, stride, out_ch, reps) in STAGE_CFG:
        for r in range(reps):
            st = stride if r == 0 else 1
            mid = in_ch * exp
            rd = max(1, in_ch // 4)          # SE reduced channels = 0.25 * block input
            bp = {"kernel": k, "stride": st,
                  "residual": (st == 1 and in_ch == out_ch)}
            if exp != 1:
                es, eb = _bn_fold(kg, mid)
                bp.update(expand_w=conv_w((in_ch, mid), in_ch), expand_s=es, expand_b=eb)
            ds, db = _bn_fold(kg, mid)
            bp.update(dw_w=conv_w((k, k, mid), k * k, dtype=jnp.float32), dw_s=ds, dw_b=db)
            bp.update(se_w1=conv_w((mid, rd), mid),
                      se_b1=jnp.zeros((rd,), jnp.float32),
                      se_w2=conv_w((rd, mid), rd),
                      se_b2=jnp.zeros((mid,), jnp.float32))
            ps, pb = _bn_fold(kg, out_ch)
            bp.update(pw_w=conv_w((mid, out_ch), mid), pw_s=ps, pw_b=pb)
            blocks.append(bp)
            in_ch = out_ch
    params["blocks"] = blocks

    hs, hb = _bn_fold(kg, 1280)
    params["head"] = dict(w=conv_w((in_ch, 1280), in_ch), s=hs, b=hb)
    # classifier padded to 128 output lanes (lane-dense store); logits sliced to 88 in glue
    fc_w = jax.random.normal(kg(), (1280, 88), jnp.float32) * 0.02
    fc_w = jnp.pad(fc_w, ((0, 0), (0, 40))).astype(jnp.bfloat16)
    params["fc"] = dict(w=fc_w, b=jnp.zeros((128,), jnp.float32))
    return params


# ----------------------------------------------------------------------------- forward
def efficientnet_b0_forward(params, x_nchw):
    x = jnp.transpose(x_nchw, (0, 2, 3, 1)).astype(jnp.float32)   # NCHW -> NHWC
    N = x.shape[0]

    # stem: 3x3 s2 conv (im2col padded to 32 + Pallas bf16 matmul) + BN + SiLU
    patches, Ho, Wo = im2col(x, K=3, stride=2, pad=1)
    patches = jnp.pad(patches, ((0, 0), (0, 0), (0, 0), (0, 32 - patches.shape[-1])))
    x = matmul_bn_act(patches.reshape(N * Ho * Wo, 32),
                      params["stem"]["w"], params["stem"]["s"], params["stem"]["b"],
                      act="silu")
    x = x.reshape(N, Ho, Wo, 32)

    # MBConv blocks: [expand 1x1] -> depthwise(+SE pool) -> fused SE gate + project(+res)
    for bp in params["blocks"]:
        shortcut = x
        h = x
        if "expand_w" in bp:
            h = conv1x1_bn_act(h, bp["expand_w"], bp["expand_s"], bp["expand_b"],
                               act="silu")
        h, pooled = depthwise_bn_silu_pool(h, bp["dw_w"], bp["dw_s"], bp["dw_b"],
                                           bp["stride"])
        x = se_project(h, pooled, bp, shortcut if bp["residual"] else None)

    # head: 1x1 conv 320 -> 1280 + BN + SiLU, global pool, classifier (dropout = identity)
    n_, hh, ww, c_ = x.shape
    x = matmul_bn_act(x.reshape(n_ * hh * ww, c_), params["head"]["w"],
                      params["head"]["s"], params["head"]["b"], act="silu")
    x = x.reshape(n_, hh * ww, 1280)
    logits = pool_classifier(x, params["fc"]["w"], params["fc"]["b"])
    return logits[:, :88]


if __name__ == "__main__":
    key = jax.random.PRNGKey(0)
    pkey, xkey = jax.random.split(key)
    params = init_params(pkey)

    # PyTorch-style NCHW input (small spatial size; all shapes consistent with B0)
    x = jax.random.normal(xkey, (2, 3, 32, 32), jnp.float32)

    logits = efficientnet_b0_forward(params, x)
    logits = jax.block_until_ready(logits)
    assert logits.shape == (2, 88) and logits.dtype == jnp.float32
    print("KERNEL_OK")
</pallas_src>

<mosaic_0001>
module attributes {stable_mosaic.version = 11 : i64} {
  func.func @_mm_kernel(%arg0: i32, %arg1: memref<512x32xf32, #tpu.memory_space<vmem>>, %arg2: memref<32x32xbf16, #tpu.memory_space<vmem>>, %arg3: memref<1x32xf32, #tpu.memory_space<vmem>>, %arg4: memref<1x32xf32, #tpu.memory_space<vmem>>, %arg5: memref<512x32xbf16, #tpu.memory_space<vmem>>) attributes {dimension_semantics = [#tpu.dimension_semantics<parallel>], iteration_bounds = array<i64: 1>, scalar_prefetch = 0 : i64, scratch_operands = 0 : i64, tpu.core_type = #tpu.core_type<tc>, window_params = [{transform_indices = @transform_0, window_bounds = array<i64: 512, 32>}, {pipeline_mode = #tpu.pipeline_mode<synchronous>, transform_indices = @transform_1, window_bounds = array<i64: 32, 32>}, {pipeline_mode = #tpu.pipeline_mode<synchronous>, transform_indices = @transform_2, window_bounds = array<i64: 1, 32>}, {pipeline_mode = #tpu.pipeline_mode<synchronous>, transform_indices = @transform_3, window_bounds = array<i64: 1, 32>}, {transform_indices = @transform_4, window_bounds = array<i64: 512, 32>}]} {
    %c0 = arith.constant 0 : index
    %c0_0 = arith.constant 0 : index
    %0 = vector.load %arg1[%c0, %c0_0] : memref<512x32xf32, #tpu.memory_space<vmem>>, vector<512x32xf32>
    %1 = arith.truncf %0 : vector<512x32xf32> to vector<512x32xbf16>
    %c0_1 = arith.constant 0 : index
    %c0_2 = arith.constant 0 : index
    %2 = vector.load %arg2[%c0_1, %c0_2] : memref<32x32xbf16, #tpu.memory_space<vmem>>, vector<32x32xbf16>
    %cst = arith.constant dense<0.000000e+00> : vector<512x32xf32>
    %3 = tpu.matmul %1, %2, %cst {dimension_numbers = #tpu.dot_dimension_numbers<[1], [0], [0], [1], [0, 0, 1, 1], [], []>} : vector<512x32xbf16>, vector<32x32xbf16>, vector<512x32xf32> -> vector<512x32xf32>
    %c0_3 = arith.constant 0 : index
    %c0_4 = arith.constant 0 : index
    %4 = vector.load %arg3[%c0_3, %c0_4] : memref<1x32xf32, #tpu.memory_space<vmem>>, vector<1x32xf32>
    %5 = vector.broadcast %4 : vector<1x32xf32> to vector<512x32xf32>
    %6 = arith.mulf %3, %5 : vector<512x32xf32>
    %c0_5 = arith.constant 0 : index
    %c0_6 = arith.constant 0 : index
    %7 = vector.load %arg4[%c0_5, %c0_6] : memref<1x32xf32, #tpu.memory_space<vmem>>, vector<1x32xf32>
    %8 = vector.broadcast %7 : vector<1x32xf32> to vector<512x32xf32>
    %9 = arith.addf %6, %8 : vector<512x32xf32>
    %10 = arith.negf %9 : vector<512x32xf32>
    %11 = math.exp %10 : vector<512x32xf32>
    %cst_7 = arith.constant 1.000000e+00 : f32
    %12 = vector.broadcast %cst_7 : f32 to vector<512x32xf32>
    %13 = arith.addf %12, %11 : vector<512x32xf32>
    %14 = arith.divf %12, %13 : vector<512x32xf32>
    %15 = arith.mulf %9, %14 : vector<512x32xf32>
    %16 = arith.truncf %15 : vector<512x32xf32> to vector<512x32xbf16>
    %c0_8 = arith.constant 0 : index
    %c0_9 = arith.constant 0 : index
    %17 = vector.load %arg5[%c0_8, %c0_9] : memref<512x32xbf16, #tpu.memory_space<vmem>>, vector<512x32xbf16>
    tpu.vector_store %arg5[%c0_8, %c0_9], %16 {strides = array<i32>} : memref<512x32xbf16, #tpu.memory_space<vmem>>, vector<512x32xbf16>,
    return
  }
  func.func @transform_0(%arg0: i32) -> (i32, i32) {
    %c0_i32 = arith.constant 0 : i32
    %c0_i32_0 = arith.constant 0 : i32
    return %arg0, %c0_i32 : i32, i32
  }
  func.func @transform_1(%arg0: i32) -> (i32, i32) {
    %c0_i32 = arith.constant 0 : i32
    %c0_i32_0 = arith.constant 0 : i32
    %c0_i32_1 = arith.constant 0 : i32
    return %c0_i32, %c0_i32_0 : i32, i32
  }
  func.func @transform_2(%arg0: i32) -> (i32, i32) {
    %c0_i32 = arith.constant 0 : i32
    %c0_i32_0 = arith.constant 0 : i32
    %c0_i32_1 = arith.constant 0 : i32
    return %c0_i32, %c0_i32_0 : i32, i32
  }
  func.func @transform_3(%arg0: i32) -> (i32, i32) {
    %c0_i32 = arith.constant 0 : i32
    %c0_i32_0 = arith.constant 0 : i32
    %c0_i32_1 = arith.constant 0 : i32
    return %c0_i32, %c0_i32_0 : i32, i32
  }
  func.func @transform_4(%arg0: i32) -> (i32, i32) {
    %c0_i32 = arith.constant 0 : i32
    %c0_i32_0 = arith.constant 0 : i32
    return %arg0, %c0_i32 : i32, i32
  }
}

</mosaic_0001>

<bundles_post_ra>
// kernel: tpu_custom_call.1
= control target key start
LH: loop header
LB: loop body
LE: loop exit
PB: predicated region body
PF: predicated region fallthrough
CT: control target
= control target key end

     0   :  { %vm130_vm0 = vcmask 261120   ;;  %vm1876_vm6 = vcmask 257024   ;;  %s4175_s1 = inlined_call_operand.vmem [shape: bf16[32,32], index: 1, kind: input, shape index: {}]   ;;  %s4176_s0 = inlined_call_operand.vmem [shape: f32[512,32], index: 0, kind: input, shape index: {}]   ;;  %s4177_s2 = inlined_call_operand.vmem [shape: f32[1,32], index: 2, kind: input, shape index: {}]   ;;  %s4178_s3 = inlined_call_operand.vmem [shape: f32[1,32], index: 3, kind: input, shape index: {}]   ;;  %s4179_s4 = inlined_call_operand.vmem [shape: bf16[512,32], index: 4, kind: output, shape index: {}]  }
   0x1   :  { %v2050_v0 = vld [vmem:[%s4175_s1 + $0x8] sm:$0xff]  ;;  %v2049_v1 = vld [vmem:[%s4175_s1] sm:$0xff]  ;;  %v20_v14 = vld [vmem:[%s4176_s0 + $0x10] sm:$0xff] }
   0x2   :  { %v18_v2 = vld [vmem:[%s4176_s0] sm:$0xff]  ;;  %v19_v3 = vld [vmem:[%s4176_s0 + $0x8] sm:$0xff]  ;;  %233 = vmatpush.bf16.msra.mxu0 %v2050_v0  ;;  %2051 = vmatpush.bf16.msra.mxu1 %v2050_v0  ;;  %v21_v15 = vld [vmem:[%s4176_s0 + $0x18] sm:$0xff] }
   0x3   :  { %v34_v4 = vld [vmem:[%s4176_s0 + $0x80] sm:$0xff]  ;;  %v35_v5 = vld [vmem:[%s4176_s0 + $0x88] sm:$0xff]  ;;  %2052 = vmatpush.bf16.msra.mxu2 %v2050_v0  ;;  %2053 = vmatpush.bf16.msra.mxu3 %v2050_v0  ;;  %v82_v10 = vpack.c.bf16 %v19_v3, %v18_v2  ;;  %v36_v16 = vld [vmem:[%s4176_s0 + $0x90] sm:$0xff]  ;;  %v83_v22 = vpack.c.bf16 %v21_v15, %v20_v14 }
   0x4   :  { %v50_v6 = vld [vmem:[%s4176_s0 + $0x100] sm:$0xff]  ;;  %v51_v7 = vld [vmem:[%s4176_s0 + $0x108] sm:$0xff]  ;;  %v90_v11 = vpack.c.bf16 %v35_v5, %v34_v4  ;;  %v37_v17 = vld [vmem:[%s4176_s0 + $0x98] sm:$0xff] }
   0x5   :  { %v66_v8 = vld [vmem:[%s4176_s0 + $0x180] sm:$0xff]  ;;  %v67_v9 = vld [vmem:[%s4176_s0 + $0x188] sm:$0xff]  ;;  %v98_v12 = vpack.c.bf16 %v51_v7, %v50_v6  ;;  %v52_v18 = vld [vmem:[%s4176_s0 + $0x110] sm:$0xff]  ;;  %v91_v23 = vpack.c.bf16 %v37_v17, %v36_v16 }
   0x6   :  { %234 = vmatpush.bf16.msra.mxu0 %v2049_v1  ;;  %2054 = vmatpush.bf16.msra.mxu1 %v2049_v1  ;;  %v106_v13 = vpack.c.bf16 %v67_v9, %v66_v8  ;;  %v53_v19 = vld [vmem:[%s4176_s0 + $0x118] sm:$0xff]  ;;  %v68_v20 = vld [vmem:[%s4176_s0 + $0x190] sm:$0xff]  ;;  %v22_v26 = vld [vmem:[%s4176_s0 + $0x20] sm:$0xff] }
   0x7   :  { %2055 = vmatpush.bf16.msra.mxu2 %v2049_v1  ;;  %2056 = vmatpush.bf16.msra.mxu3 %v2049_v1  ;;  %v69_v21 = vld [vmem:[%s4176_s0 + $0x198] sm:$0xff]  ;;  %v99_v24 = vpack.c.bf16 %v53_v19, %v52_v18  ;;  %v23_v27 = vld [vmem:[%s4176_s0 + $0x28] sm:$0xff]  ;;  %v38_v28 = vld [vmem:[%s4176_s0 + $0xa0] sm:$0xff] }
   0x8   :  { %v107_v25 = vpack.c.bf16 %v69_v21, %v68_v20  ;;  %v39_v29 = vld [vmem:[%s4176_s0 + $0xa8] sm:$0xff]  ;;  %v54_v30 = vld [vmem:[%s4176_s0 + $0x120] sm:$0xff]  ;;  %v84_v34 = vpack.c.bf16 %v23_v27, %v22_v26  ;;  %v24_v38 = vld [vmem:[%s4176_s0 + $0x30] sm:$0xff] }
   0x9   :  { %1953 = vmatmul.msk.bf16.vlgmr.msra.gmra.mxu0 %vm130_vm0, %v82_v10  ;;  %1961 = vmatmul.msk.bf16.vlgmr.msra.gmra.mxu1 %vm130_vm0, %v90_v11  ;;  %v55_v31 = vld [vmem:[%s4176_s0 + $0x128] sm:$0xff]  ;;  %v70_v32 = vld [vmem:[%s4176_s0 + $0x1a0] sm:$0xff]  ;;  %v92_v35 = vpack.c.bf16 %v39_v29, %v38_v28  ;;  %v25_v39 = vld [vmem:[%s4176_s0 + $0x38] sm:$0xff] }
   0xa   :  { %1969 = vmatmul.msk.bf16.vlgmr.msra.gmra.mxu2 %vm130_vm0, %v98_v12  ;;  %1977 = vmatmul.msk.bf16.vlgmr.msra.gmra.mxu3 %vm130_vm0, %v106_v13  ;;  %v71_v33 = vld [vmem:[%s4176_s0 + $0x1a8] sm:$0xff]  ;;  %v100_v36 = vpack.c.bf16 %v55_v31, %v54_v30  ;;  %v40_v40 = vld [vmem:[%s4176_s0 + $0xb0] sm:$0xff]  ;;  %v41_v41 = vld [vmem:[%s4176_s0 + $0xb8] sm:$0xff]  ;;  %v85_v46 = vpack.c.bf16 %v25_v39, %v24_v38 }
   0xb   :  { %v108_v37 = vpack.c.bf16 %v71_v33, %v70_v32  ;;  %v56_v42 = vld [vmem:[%s4176_s0 + $0x130] sm:$0xff]  ;;  %v57_v43 = vld [vmem:[%s4176_s0 + $0x138] sm:$0xff]  ;;  %v93_v47 = vpack.c.bf16 %v41_v41, %v40_v40  ;;  %v26_v50 = vld [vmem:[%s4176_s0 + $0x40] sm:$0xff] }
   0xc   :  { %v72_v44 = vld [vmem:[%s4176_s0 + $0x1b0] sm:$0xff]  ;;  %v73_v45 = vld [vmem:[%s4176_s0 + $0x1b8] sm:$0xff]  ;;  %v101_v48 = vpack.c.bf16 %v57_v43, %v56_v42  ;;  %v27_v51 = vld [vmem:[%s4176_s0 + $0x48] sm:$0xff] }
   0xd   :  { %v109_v49 = vpack.c.bf16 %v73_v45, %v72_v44  ;;  %v42_v52 = vld [vmem:[%s4176_s0 + $0xc0] sm:$0xff]  ;;  %v43_v53 = vld [vmem:[%s4176_s0 + $0xc8] sm:$0xff]  ;;  %v86_v58 = vpack.c.bf16 %v27_v51, %v26_v50  ;;  %v28_v62 = vld [vmem:[%s4176_s0 + $0x50] sm:$0xff] }
   0xe   :  { %v58_v54 = vld [vmem:[%s4176_s0 + $0x140] sm:$0xff]  ;;  %v59_v55 = vld [vmem:[%s4176_s0 + $0x148] sm:$0xff]  ;;  %v94_v59 = vpack.c.bf16 %v43_v53, %v42_v52  ;;  %v29_v63 = vld [vmem:[%s4176_s0 + $0x58] sm:$0xff] }
   0xf   :  { %v74_v56 = vld [vmem:[%s4176_s0 + $0x1c0] sm:$0xff]  ;;  %v75_v57 = vld [vmem:[%s4176_s0 + $0x1c8] sm:$0xff]  ;;  %v102_v60 = vpack.c.bf16 %v59_v55, %v58_v54  ;;  %v44_v0 = vld [vmem:[%s4176_s0 + $0xd0] sm:$0xff]  ;;  %v87_v6 = vpack.c.bf16 %v29_v63, %v28_v62 }
  0x10   :  { %v110_v61 = vpack.c.bf16 %v75_v57, %v74_v56  ;;  %v45_v1 = vld [vmem:[%s4176_s0 + $0xd8] sm:$0xff]  ;;  %v60_v2 = vld [vmem:[%s4176_s0 + $0x150] sm:$0xff]  ;;  %v30_v10 = vld [vmem:[%s4176_s0 + $0x60] sm:$0xff] }
  0x11   :  { %v61_v3 = vld [vmem:[%s4176_s0 + $0x158] sm:$0xff]  ;;  %v76_v4 = vld [vmem:[%s4176_s0 + $0x1d0] sm:$0xff]  ;;  %v95_v7 = vpack.c.bf16 %v45_v1, %v44_v0  ;;  %v31_v11 = vld [vmem:[%s4176_s0 + $0x68] sm:$0xff] }
  0x12   :  { %v77_v5 = vld [vmem:[%s4176_s0 + $0x1d8] sm:$0xff]  ;;  %v103_v8 = vpack.c.bf16 %v61_v3, %v60_v2  ;;  %v46_v12 = vld [vmem:[%s4176_s0 + $0xe0] sm:$0xff]  ;;  %v47_v13 = vld [vmem:[%s4176_s0 + $0xe8] sm:$0xff]  ;;  %v88_v18 = vpack.c.bf16 %v31_v11, %v30_v10 }
  0x13   :  { %v111_v9 = vpack.c.bf16 %v77_v5, %v76_v4  ;;  %v62_v14 = vld [vmem:[%s4176_s0 + $0x160] sm:$0xff]  ;;  %v63_v15 = vld [vmem:[%s4176_s0 + $0x168] sm:$0xff]  ;;  %v96_v19 = vpack.c.bf16 %v47_v13, %v46_v12  ;;  %v64_v26 = vld [vmem:[%s4176_s0 + $0x170] sm:$0xff] }
  0x14   :  { %v78_v16 = vld [vmem:[%s4176_s0 + $0x1e0] sm:$0xff]  ;;  %v79_v17 = vld [vmem:[%s4176_s0 + $0x1e8] sm:$0xff]  ;;  %v104_v20 = vpack.c.bf16 %v63_v15, %v62_v14  ;;  %v65_v27 = vld [vmem:[%s4176_s0 + $0x178] sm:$0xff] }
  0x15   :  { %v112_v21 = vpack.c.bf16 %v79_v17, %v78_v16  ;;  %v80_v28 = vld [vmem:[%s4176_s0 + $0x1f0] sm:$0xff]  ;;  %v81_v29 = vld [vmem:[%s4176_s0 + $0x1f8] sm:$0xff]  ;;  %v105_v32 = vpack.c.bf16 %v65_v27, %v64_v26 }
  0x16   :  { %v113_v33 = vpack.c.bf16 %v81_v29, %v80_v28 }
  0x19   :  { %1954 = vmatmul.msk.bf16.gmra.mxu0 %vm130_vm0, %v83_v22  ;;  %1962 = vmatmul.msk.bf16.gmra.mxu1 %vm130_vm0, %v91_v23  ;;  %v32_v22 = vld [vmem:[%s4176_s0 + $0x70] sm:$0xff]  ;;  %v33_v23 = vld [vmem:[%s4176_s0 + $0x78] sm:$0xff] }
  0x1a   :  { %1970 = vmatmul.msk.bf16.gmra.mxu2 %vm130_vm0, %v99_v24  ;;  %1978 = vmatmul.msk.bf16.gmra.mxu3 %vm130_vm0, %v107_v25  ;;  %v48_v24 = vld [vmem:[%s4176_s0 + $0xf0] sm:$0xff]  ;;  %v49_v25 = vld [vmem:[%s4176_s0 + $0xf8] sm:$0xff]  ;;  %v89_v30 = vpack.c.bf16 %v33_v23, %v32_v22 }
  0x1b   :  { %v97_v31 = vpack.c.bf16 %v49_v25, %v48_v24 }
  0x29   :  { %1955 = vmatmul.msk.bf16.gmra.mxu0 %vm130_vm0, %v84_v34  ;;  %1963 = vmatmul.msk.bf16.gmra.mxu1 %vm130_vm0, %v92_v35  ;;  %v2577_v34 = vld [vmem:[%s4177_s2] ss:$0 sm:$0xff] }
  0x2a   :  { %1971 = vmatmul.msk.bf16.gmra.mxu2 %vm130_vm0, %v100_v36  ;;  %1979 = vmatmul.msk.bf16.gmra.mxu3 %vm130_vm0, %v108_v37  ;;  %v2582_v35 = vld [vmem:[%s4178_s3] ss:$0 sm:$0xff] }
  0x39   :  { %1956 = vmatmul.msk.bf16.gmra.mxu0 %vm130_vm0, %v85_v46  ;;  %1964 = vmatmul.msk.bf16.gmra.mxu1 %vm130_vm0, %v93_v47 }
  0x3a   :  { %1972 = vmatmul.msk.bf16.gmra.mxu2 %vm130_vm0, %v101_v48  ;;  %1980 = vmatmul.msk.bf16.gmra.mxu3 %vm130_vm0, %v109_v49 }
  0x49   :  { %1957 = vmatmul.msk.bf16.gmra.mxu0 %vm130_vm0, %v86_v58  ;;  %1965 = vmatmul.msk.bf16.gmra.mxu1 %vm130_vm0, %v94_v59 }
  0x4a   :  { %1973 = vmatmul.msk.bf16.gmra.mxu2 %vm130_vm0, %v102_v60  ;;  %1981 = vmatmul.msk.bf16.gmra.mxu3 %vm130_vm0, %v110_v61 }
  0x59   :  { %1958 = vmatmul.msk.bf16.gmra.mxu0 %vm130_vm0, %v87_v6  ;;  %1966 = vmatmul.msk.bf16.gmra.mxu1 %vm130_vm0, %v95_v7 }
  0x5a   :  { %1974 = vmatmul.msk.bf16.gmra.mxu2 %vm130_vm0, %v103_v8  ;;  %1982 = vmatmul.msk.bf16.gmra.mxu3 %vm130_vm0, %v111_v9 }
  0x69   :  { %1959 = vmatmul.msk.bf16.gmra.mxu0 %vm130_vm0, %v88_v18  ;;  %1967 = vmatmul.msk.bf16.gmra.mxu1 %vm130_vm0, %v96_v19 }
  0x6a   :  { %1975 = vmatmul.msk.bf16.gmra.mxu2 %vm130_vm0, %v104_v20  ;;  %1983 = vmatmul.msk.bf16.gmra.mxu3 %vm130_vm0, %v112_v21 }
  0x79   :  { %1960 = vmatmul.msk.bf16.gmra.mxu0 %vm130_vm0, %v89_v30  ;;  %1968 = vmatmul.msk.bf16.gmra.mxu1 %vm130_vm0, %v97_v31 }
  0x7a   :  { %1976 = vmatmul.msk.bf16.gmra.mxu2 %vm130_vm0, %v105_v32  ;;  %1984 = vmatmul.msk.bf16.gmra.mxu3 %vm130_vm0, %v113_v33 }
  0x86   :  { %v236_v36 = vpop.f32.mrf.mxu0  ;;  %v276_v37 = vpop.f32.mrf.mxu1 }
  0x87   :  { %v400_v38 = vmul.f32 %v2577_v34, %v236_v36  ;;  %v416_v39 = vmul.f32 %v2577_v34, %v276_v37 }
  0x89   :  { %v2587_v40 = vadd.f32 %v2582_v35, %v400_v38  ;;  %v2590_v41 = vadd.f32 %v2582_v35, %v416_v39 }
  0x8b   :  { %v1985_v42 = vmul.f32 -1.442695, %v2587_v40  ;;  %v2001_v43 = vmul.f32 -1.442695, %v2590_v41 }
  0x8d   :  { %2059 = vpow2.f32 %v1985_v42  ;;  %v316_v44 = vpop.f32.mrf.mxu2  ;;  %v356_v45 = vpop.f32.mrf.mxu3 }
  0x8e   :  { %2061 = vpow2.f32 %v2001_v43  ;;  %v432_v46 = vmul.f32 %v2577_v34, %v316_v44  ;;  %v448_v47 = vmul.f32 %v2577_v34, %v356_v45  ;;  %v238_v48 = vpop.f32.mrf.mxu0  ;;  %v278_v49 = vpop.f32.mrf.mxu1 }
  0x8f   :  { %v401_v50 = vmul.f32 %v2577_v34, %v238_v48  ;;  %v417_v51 = vmul.f32 %v2577_v34, %v278_v49 }
  0x90   :  { %v2599_v52 = vadd.f32 %v2582_v35, %v432_v46  ;;  %v2602_v53 = vadd.f32 %v2582_v35, %v448_v47 }
  0x91   :  { %v2605_v54 = vadd.f32 %v2582_v35, %v401_v50  ;;  %v2608_v55 = vadd.f32 %v2582_v35, %v417_v51 }
  0x92   :  { %v2017_v56 = vmul.f32 -1.442695, %v2599_v52  ;;  %v2033_v57 = vmul.f32 -1.442695, %v2602_v53 }
  0x93   :  { %v2060_v58 = vpop.eup %2059  ;;  %v1986_v61 = vmul.f32 -1.442695, %v2605_v54  ;;  %v2002_v63 = vmul.f32 -1.442695, %v2608_v55 }
  0x94   :  { %v2062_v59 = vpop.eup %2061  ;;  %v2612_v60 = vadd.f32 1.0, %v2060_v58  ;;  %2063 = vpow2.f32 %v2017_v56 }
  0x95   :  { %v2615_v62 = vadd.f32 1.0, %v2062_v59  ;;  %2065 = vpow2.f32 %v2033_v57  ;;  %v318_v0 = vpop.f32.mrf.mxu2  ;;  %v358_v2 = vpop.f32.mrf.mxu3 }
  0x96   :  { %2067 = vrcp.f32 %v2612_v60  ;;  %v433_v1 = vmul.f32 %v2577_v34, %v318_v0  ;;  %v241_v3 = vpop.f32.mrf.mxu0  ;;  %v797_v4 = vand.u32 2147483647, %v2612_v60  ;;  %v799_v5 = vand.u32 2147483648, %v2612_v60  ;;  %v281_v6 = vpop.f32.mrf.mxu1 }
  0x97   :  { %2069 = vrcp.f32 %v2615_v62  ;;  %v1037_v8 = vand.u32 2147483647, %v2615_v62  ;;  %v1039_v9 = vand.u32 2147483648, %v2615_v62  ;;  %v449_v13 = vmul.f32 %v2577_v34, %v358_v2 }
  0x98   :  { %2071 = vpow2.f32 %v1986_v61  ;;  %v2626_v10 = vadd.f32 %v2582_v35, %v433_v1  ;;  %v402_v14 = vmul.f32 %v2577_v34, %v241_v3  ;;  %vm793_vm1 = vweird.f32 %v2612_v60 }
  0x99   :  { %2073 = vpow2.f32 %v2002_v63  ;;  %vm1033_vm2 = vweird.f32 %v2615_v62  ;;  %v418_v17 = vmul.f32 %v2577_v34, %v281_v6  ;;  %vm2638_vm3 = vcmp.eq.f32.partialorder %v797_v4, 8.507059e+37 }
  0x9a   :  { %v2064_v7 = vpop.eup %2063  ;;  %v800_v21 = vor.u32 1.1754944e-38, %v799_v5  ;;  %vm2644_vm4 = vcmp.eq.f32.partialorder %v1037_v8, 8.507059e+37  ;;  %v1040_v25 = vor.u32 1.1754944e-38, %v1039_v9  ;;  %v2018_v26 = vmul.f32 -1.442695, %v2626_v10 }
  0x9b   :  { %v2066_v11 = vpop.eup %2065  ;;  %v2628_v12 = vadd.f32 1.0, %v2064_v7  ;;  %v2651_v29 = vadd.f32 %v2582_v35, %v449_v13  ;;  %v2654_v30 = vadd.f32 %v2582_v35, %v402_v14  ;;  %v2658_v33 = vadd.f32 %v2582_v35, %v418_v17 }
  0x9c   :  { %v2068_v15 = vpop.eup %2067  ;;  %v2634_v16 = vadd.f32 1.0, %v2066_v11 }
  0x9d   :  { %v2070_v18 = vpop.eup %2069  ;;  %v789_v19 = vmul.f32 %v2068_v15, %v2612_v60  ;;  %2075 = vrcp.f32 %v2628_v12  ;;  %vm794_vm5 = vweird.f32 %v2068_v15  ;;  %v1277_v32 = vand.u32 2147483647, %v2628_v12 }
  0x9e   :  { %v2072_v22 = vpop.eup %2071  ;;  %v1029_v23 = vmul.f32 %v2070_v18, %v2615_v62  ;;  %2077 = vrcp.f32 %v2634_v16  ;;  %v1279_v37 = vand.u32 2147483648, %v2628_v12  ;;  %vm1034_vm7 = vweird.f32 %v2070_v18  ;;  %vm795_vm9 = vmor %vm793_vm1, %vm794_vm5 }
  0x9f   :  { %v2074_v27 = vpop.eup %2073  ;;  %v790_v28 = vsub.f32 1.0, %v789_v19  ;;  %v2661_v38 = vadd.f32 1.0, %v2072_v22  ;;  %v1517_v43 = vand.u32 2147483647, %v2634_v16  ;;  %2079 = vpow2.f32 %v2018_v26  ;;  %vm1035_vm12 = vmor %vm1033_vm2, %vm1034_vm7 }
  0xa0   :  { %v1030_v31 = vsub.f32 1.0, %v1029_v23  ;;  %v2663_v39 = vadd.f32 1.0, %v2074_v27  ;;  %vm1273_vm8 = vweird.f32 %v2628_v12  ;;  %v1519_v46 = vand.u32 2147483648, %v2634_v16  ;;  %v321_v27 = vpop.f32.mrf.mxu2 }
  0xa1   :  { %v791_v36 = vmul.f32 %v2068_v15, %v790_v28  ;;  %2081 = vrcp.f32 %v2661_v38  ;;  %vm2673_vm10 = vcmp.eq.f32.partialorder %v1277_v32, 8.507059e+37  ;;  %vm1513_vm11 = vweird.f32 %v2634_v16 }
  0xa2   :  { %v1031_v42 = vmul.f32 %v2070_v18, %v1030_v31  ;;  %v1280_v56 = vor.u32 1.1754944e-38, %v1279_v37  ;;  %2083 = vrcp.f32 %v2663_v39  ;;  %v2034_v57 = vmul.f32 -1.442695, %v2651_v29 }
  0xa3   :  { %v2076_v44 = vpop.eup %2075  ;;  %v792_v45 = vadd.f32 %v2068_v15, %v791_v36  ;;  %vm2686_vm13 = vcmp.eq.f32.partialorder %v1517_v43, 8.507059e+37  ;;  %v1520_v1 = vor.u32 1.1754944e-38, %v1519_v46  ;;  %v812_v2 = vand.u32 2147483647, %v2661_v38 }
  0xa4   :  { %v1032_v47 = vadd.f32 %v2070_v18, %v1031_v42  ;;  %v1269_v48 = vmul.f32 %v2076_v44, %v2628_v12  ;;  %v2078_v50 = vpop.eup %2077  ;;  %vm1274_vm14 = vweird.f32 %v2076_v44  ;;  %2085 = vpow2.f32 %v2034_v57 }
  0xa5   :  { %v796_v51 = vsel %vm795_vm9, %v2068_v15, %v792_v45  ;;  %v1509_v61 = vmul.f32 %v2078_v50, %v2634_v16  ;;  %v2080_v3 = vpop.eup %2079  ;;  %vm1514_vm15 = vweird.f32 %v2078_v50  ;;  %vm1275_vm0 = vmor %vm1273_vm8, %vm1274_vm14  ;;  %vm808_vm1 = vweird.f32 %v2661_v38 }
  0xa6   :  { %v801_v58 = vsel %vm2638_vm3, %v800_v21, %v796_v51  ;;  %v1036_v59 = vsel %vm1035_vm12, %v2070_v18, %v1032_v47  ;;  %v1270_v60 = vsub.f32 1.0, %v1269_v48  ;;  %v2695_v9 = vadd.f32 1.0, %v2080_v3  ;;  %vm1515_vm3 = vmor %vm1513_vm11, %vm1514_vm15 }
  0xa7   :  { %v1748_v0 = vmul.f32 %v801_v58, %v2587_v40  ;;  %v1041_v62 = vsel %vm2644_vm4, %v1040_v25, %v1036_v59  ;;  %v1510_v6 = vsub.f32 1.0, %v1509_v61  ;;  %v2082_v7 = vpop.eup %2081  ;;  %vm2705_vm2 = vcmp.eq.f32.partialorder %v812_v2, 8.507059e+37  ;;  %v361_v59 = vpop.f32.mrf.mxu3 }
  0xa8   :  { %v1764_v4 = vmul.f32 %v1041_v62, %v2590_v41  ;;  %v1271_v5 = vmul.f32 %v2076_v44, %v1270_v60  ;;  %v804_v14 = vmul.f32 %v2082_v7, %v2661_v38  ;;  %v2084_v15 = vpop.eup %2083  ;;  %v814_v17 = vand.u32 2147483648, %v2661_v38  ;;  %v243_v60 = vpop.f32.mrf.mxu0 }
  0xa9   :  { %v1812_v8 = vpack.c.bf16 %v1748_v0, %v1748_v0  ;;  %v1511_v13 = vmul.f32 %v2078_v50, %v1510_v6  ;;  %2087 = vrcp.f32 %v2695_v9  ;;  %v1044_v12 = vmul.f32 %v2084_v15, %v2663_v39 }
  0xaa   :  { %v1828_v11 = vpack.c.bf16 %v1764_v4, %v1764_v4  ;;  %v1272_v40 = vadd.f32 %v2076_v44, %v1271_v5  ;;  %v805_v20 = vsub.f32 1.0, %v804_v14  ;;  %vm809_vm4 = vweird.f32 %v2082_v7  ;;  %v2086_v28 = vpop.eup %2085 }
  0xab   :  { %1877 = vst.msk [vmem:[%s4179_s4] sm:$0xf] %vm1876_vm6, %v1812_v8  ;;  %v1512_v19 = vadd.f32 %v2078_v50, %v1511_v13  ;;  %vm1048_vm5 = vweird.f32 %v2663_v39  ;;  %v1052_v22 = vand.u32 2147483647, %v2663_v39  ;;  %v1045_v26 = vsub.f32 1.0, %v1044_v12  ;;  %vm810_vm8 = vmor %vm808_vm1, %vm809_vm4  ;;  %v283_v8 = vpop.f32.mrf.mxu1 }
  0xac   :  { %1893 = vst.msk [vmem:[%s4179_s4 + $0x40] sm:$0xf] %vm1876_vm6, %v1828_v11  ;;  %v1276_v18 = vsel %vm1275_vm0, %v2076_v44, %v1272_v40  ;;  %v806_v25 = vmul.f32 %v2082_v7, %v805_v20  ;;  %vm1049_vm7 = vweird.f32 %v2084_v15  ;;  %v1054_v32 = vand.u32 2147483648, %v2663_v39 }
  0xad   :  { %v1281_v21 = vsel %vm2673_vm10, %v1280_v56, %v1276_v18  ;;  %v1516_v24 = vsel %vm1515_vm3, %v2078_v50, %v1512_v19  ;;  %v1987_v16 = vmul.f32 -1.442695, %v2654_v30  ;;  %v1046_v43 = vmul.f32 %v2084_v15, %v1045_v26  ;;  %vm1050_vm9 = vmor %vm1048_vm5, %vm1049_vm7 }
  0xae   :  { %v1780_v23 = vmul.f32 %v1281_v21, %v2599_v52  ;;  %v1521_v31 = vsel %vm2686_vm13, %v1520_v1, %v1516_v24  ;;  %v807_v42 = vadd.f32 %v2082_v7, %v806_v25  ;;  %v815_v52 = vor.u32 1.1754944e-38, %v814_v17 }
  0xaf   :  { %v1796_v37 = vmul.f32 %v1521_v31, %v2602_v53  ;;  %v2088_v44 = vpop.eup %2087  ;;  %v2732_v45 = vadd.f32 1.0, %v2086_v28  ;;  %2089 = vpow2.f32 %v1987_v16  ;;  %v2003_v46 = vmul.f32 -1.442695, %v2658_v33 }
  0xb0   :  { %v1844_v36 = vpack.c.bf16 %v1780_v23, %v1780_v23  ;;  %v811_v53 = vsel %vm810_vm8, %v2082_v7, %v807_v42  ;;  %v1047_v48 = vadd.f32 %v2084_v15, %v1046_v43  ;;  %v1284_v49 = vmul.f32 %v2088_v44, %v2695_v9 }
  0xb1   :  { %v1860_v47 = vpack.c.bf16 %v1796_v37, %v1796_v37  ;;  %v816_v38 = vsel %vm2705_vm2, %v815_v52, %v811_v53  ;;  %vm1053_vm10 = vcmp.eq.f32.partialorder %v1052_v22, 8.507059e+37  ;;  %v1055_v50 = vor.u32 1.1754944e-38, %v1054_v32 }
  0xb2   :  { %1909 = vst.msk [vmem:[%s4179_s4 + $0x80] sm:$0xf] %vm1876_vm6, %v1844_v36  ;;  %2091 = vrcp.f32 %v2732_v45  ;;  %v1749_v51 = vmul.f32 %v816_v38, %v2605_v54  ;;  %v1051_v56 = vsel %vm1050_vm9, %v2084_v15, %v1047_v48  ;;  %v1285_v57 = vsub.f32 1.0, %v1284_v49  ;;  %v363_v36 = vpop.f32.mrf.mxu3 }
  0xb3   :  { %1925 = vst.msk [vmem:[%s4179_s4 + $0xc0] sm:$0xf] %vm1876_vm6, %v1860_v47  ;;  %v1292_v58 = vand.u32 2147483647, %v2695_v9  ;;  %v1056_v61 = vsel %vm1053_vm10, %v1055_v50, %v1051_v56  ;;  %v1294_v39 = vand.u32 2147483648, %v2695_v9  ;;  %2093 = vpow2.f32 %v2003_v46 }
  0xb4   :  { %v434_v63 = vmul.f32 %v2577_v34, %v321_v27  ;;  %v1813_v0 = vpack.c.bf16 %v1749_v51, %v1749_v51  ;;  %v1765_v62 = vmul.f32 %v1056_v61, %v2608_v55  ;;  %v1286_v1 = vmul.f32 %v2088_v44, %v1285_v57 }
  0xb5   :  { %vm1289_vm11 = vweird.f32 %v2088_v44  ;;  %v2090_v2 = vpop.eup %2089  ;;  %vm1288_vm12 = vweird.f32 %v2695_v9  ;;  %v450_v3 = vmul.f32 %v2577_v34, %v361_v59  ;;  %v403_v4 = vmul.f32 %v2577_v34, %v243_v60  ;;  %v323_v9 = vpop.f32.mrf.mxu2 }
  0xb6   :  { %v2757_v54 = vadd.f32 %v2582_v35, %v434_v63  ;;  %1878 = vst.msk [vmem:[%s4179_s4 + $0x4] sm:$0xf] %vm1876_vm6, %v1813_v0  ;;  %v1829_v5 = vpack.c.bf16 %v1765_v62, %v1765_v62  ;;  %v1287_v6 = vadd.f32 %v2088_v44, %v1286_v1  ;;  %vm2765_vm13 = vcmp.eq.f32.partialorder %v1292_v58, 8.507059e+37  ;;  %vm1290_vm14 = vmor %vm1288_vm12, %vm1289_vm11  ;;  %v246_v63 = vpop.f32.mrf.mxu0 }
  0xb7   :  { %v2769_v7 = vadd.f32 1.0, %v2090_v2  ;;  %v1295_v40 = vor.u32 1.1754944e-38, %v1294_v39  ;;  %v2773_v14 = vadd.f32 %v2582_v35, %v450_v3  ;;  %v2776_v15 = vadd.f32 %v2582_v35, %v403_v4 }
  0xb8   :  { %v2092_v11 = vpop.eup %2091  ;;  %v2019_v13 = vmul.f32 -1.442695, %v2757_v54  ;;  %1894 = vst.msk [vmem:[%s4179_s4 + $0x44] sm:$0xf] %vm1876_vm6, %v1829_v5  ;;  %v1291_v41 = vsel %vm1290_vm14, %v2088_v44, %v1287_v6  ;;  %v1532_v18 = vand.u32 2147483647, %v2732_v45  ;;  %v419_v21 = vmul.f32 %v2577_v34, %v283_v8 }
  0xb9   :  { %v1524_v17 = vmul.f32 %v2092_v11, %v2732_v45  ;;  %2095 = vrcp.f32 %v2769_v7  ;;  %v2094_v19 = vpop.eup %2093  ;;  %v1296_v20 = vsel %vm2765_vm13, %v1295_v40, %v1291_v41  ;;  %v1534_v12 = vand.u32 2147483648, %v2732_v45 }
  0xba   :  { %v435_v22 = vmul.f32 %v2577_v34, %v323_v9  ;;  %v1781_v23 = vmul.f32 %v1296_v20, %v2626_v10  ;;  %v2791_v25 = vadd.f32 1.0, %v2094_v19  ;;  %2097 = vpow2.f32 %v2019_v13 }
  0xbb   :  { %v1525_v24 = vsub.f32 1.0, %v1524_v17  ;;  %v827_v26 = vand.u32 2147483647, %v2769_v7  ;;  %v2035_v27 = vmul.f32 -1.442695, %v2773_v14  ;;  %vm1529_vm15 = vweird.f32 %v2092_v11 }
  0xbc   :  { %v1988_v28 = vmul.f32 -1.442695, %v2776_v15  ;;  %v1845_v31 = vpack.c.bf16 %v1781_v23, %v1781_v23  ;;  %2099 = vrcp.f32 %v2791_v25  ;;  %vm1528_vm0 = vweird.f32 %v2732_v45 }
  0xbd   :  { %v1526_v32 = vmul.f32 %v2092_v11, %v1525_v24  ;;  %v829_v16 = vand.u32 2147483648, %v2769_v7  ;;  %2101 = vpow2.f32 %v2035_v27  ;;  %v2800_v10 = vadd.f32 %v2582_v35, %v419_v21  ;;  %vm1530_vm2 = vmor %vm1528_vm0, %vm1529_vm15 }
  0xbe   :  { %1910 = vst.msk [vmem:[%s4179_s4 + $0x84] sm:$0xf] %vm1876_vm6, %v1845_v31  ;;  %vm1533_vm1 = vcmp.eq.f32.partialorder %v1532_v18, 8.507059e+37  ;;  %2103 = vpow2.f32 %v1988_v28  ;;  %v2807_v43 = vadd.f32 %v2582_v35, %v435_v22  ;;  %v1535_v44 = vor.u32 1.1754944e-38, %v1534_v12 }
  0xbf   :  { %v2096_v37 = vpop.eup %2095  ;;  %v1527_v42 = vadd.f32 %v2092_v11, %v1526_v32  ;;  %vm823_vm3 = vweird.f32 %v2769_v7  ;;  %vm2811_vm4 = vcmp.eq.f32.partialorder %v827_v26, 8.507059e+37  ;;  %v1067_v53 = vand.u32 2147483647, %v2791_v25 }
  0xc0   :  { %v819_v52 = vmul.f32 %v2096_v37, %v2769_v7  ;;  %v2098_v46 = vpop.eup %2097  ;;  %v2004_v48 = vmul.f32 -1.442695, %v2800_v10  ;;  %v451_v49 = vmul.f32 %v2577_v34, %v363_v36  ;;  %v830_v51 = vor.u32 1.1754944e-38, %v829_v16 }
  0xc1   :  { %v1531_v47 = vsel %vm1530_vm2, %v2092_v11, %v1527_v42  ;;  %v2818_v56 = vadd.f32 1.0, %v2098_v46  ;;  %vm1063_vm5 = vweird.f32 %v2791_v25  ;;  %v2020_v59 = vmul.f32 -1.442695, %v2807_v43  ;;  %v286_v11 = vpop.f32.mrf.mxu1 }
  0xc2   :  { %v1536_v38 = vsel %vm1533_vm1, %v1535_v44, %v1531_v47  ;;  %v820_v50 = vsub.f32 1.0, %v819_v52  ;;  %v2100_v57 = vpop.eup %2099  ;;  %2105 = vpow2.f32 %v2004_v48  ;;  %vm824_vm7 = vweird.f32 %v2096_v37 }
  0xc3   :  { %v1797_v58 = vmul.f32 %v1536_v38, %v2651_v29  ;;  %v2102_v60 = vpop.eup %2101  ;;  %v1059_v39 = vmul.f32 %v2100_v57, %v2791_v25  ;;  %2107 = vrcp.f32 %v2818_v56  ;;  %vm2825_vm8 = vcmp.eq.f32.partialorder %v1067_v53, 8.507059e+37  ;;  %vm825_vm9 = vmor %vm823_vm3, %vm824_vm7 }
  0xc4   :  { %v821_v61 = vmul.f32 %v2096_v37, %v820_v50  ;;  %v2104_v0 = vpop.eup %2103  ;;  %v1069_v29 = vand.u32 2147483648, %v2791_v25  ;;  %v2831_v2 = vadd.f32 %v2582_v35, %v451_v49  ;;  %v2833_v5 = vadd.f32 1.0, %v2102_v60 }
  0xc5   :  { %v1861_v62 = vpack.c.bf16 %v1797_v58, %v1797_v58  ;;  %v1060_v4 = vsub.f32 1.0, %v1059_v39  ;;  %v2835_v6 = vadd.f32 1.0, %v2104_v0  ;;  %v1307_v55 = vand.u32 2147483647, %v2818_v56 }
  0xc6   :  { %v822_v3 = vadd.f32 %v2096_v37, %v821_v61  ;;  %v1309_v8 = vand.u32 2147483648, %v2818_v56  ;;  %2109 = vpow2.f32 %v2020_v59  ;;  %v404_v9 = vmul.f32 %v2577_v34, %v246_v63 }
  0xc7   :  { %1926 = vst.msk [vmem:[%s4179_s4 + $0xc4] sm:$0xf] %vm1876_vm6, %v1861_v62  ;;  %v1061_v13 = vmul.f32 %v2100_v57, %v1060_v4  ;;  %vm1064_vm10 = vweird.f32 %v2100_v57  ;;  %2111 = vrcp.f32 %v2833_v5  ;;  %v1070_v18 = vor.u32 1.1754944e-38, %v1069_v29 }
  0xc8   :  { %v826_v40 = vsel %vm825_vm9, %v2096_v37, %v822_v3  ;;  %v2106_v41 = vpop.eup %2105  ;;  %2113 = vrcp.f32 %v2835_v6  ;;  %v2036_v7 = vmul.f32 -1.442695, %v2831_v2  ;;  %vm1303_vm11 = vweird.f32 %v2818_v56  ;;  %vm1065_vm12 = vmor %vm1063_vm5, %vm1064_vm10 }
  0xc9   :  { %v831_v17 = vsel %vm2811_vm4, %v830_v51, %v826_v40  ;;  %v2108_v19 = vpop.eup %2107  ;;  %v1062_v12 = vadd.f32 %v2100_v57, %v1061_v13  ;;  %v2854_v21 = vmul.f32 %v2577_v34, %v286_v11  ;;  %vm2859_vm13 = vcmp.eq.f32.partialorder %v1307_v55, 8.507059e+37 }
  0xca   :  { %v1750_v20 = vmul.f32 %v831_v17, %v2654_v30  ;;  %v1299_v22 = vmul.f32 %v2108_v19, %v2818_v56  ;;  %v1310_v24 = vor.u32 1.1754944e-38, %v1309_v8  ;;  %v1547_v26 = vand.u32 2147483647, %v2833_v5 }
  0xcb   :  { %v2865_v30 = vadd.f32 %v2582_v35, %v404_v9  ;;  %v1066_v28 = vsel %vm1065_vm12, %v2100_v57, %v1062_v12  ;;  %v1549_v31 = vand.u32 2147483648, %v2833_v5  ;;  %v842_v32 = vand.u32 2147483647, %v2835_v6  ;;  %v366_v12 = vpop.f32.mrf.mxu3 }
  0xcc   :  { %v1814_v27 = vpack.c.bf16 %v1750_v20, %v1750_v20  ;;  %v2110_v25 = vpop.eup %2109  ;;  %v1071_v16 = vsel %vm2825_vm8, %v1070_v18, %v1066_v28  ;;  %v1300_v36 = vsub.f32 1.0, %v1299_v22  ;;  %vm1543_vm14 = vweird.f32 %v2833_v5 }
  0xcd   :  { %v2872_v37 = vadd.f32 1.0, %v2106_v41  ;;  %2115 = vpow2.f32 %v2036_v7  ;;  %v2112_v42 = vpop.eup %2111  ;;  %v1766_v44 = vmul.f32 %v1071_v16, %v2658_v33  ;;  %vm838_vm15 = vweird.f32 %v2835_v6 }
  0xce   :  { %1879 = vst.msk [vmem:[%s4179_s4 + $0x8] sm:$0xf] %vm1876_vm6, %v1814_v27  ;;  %v844_v52 = vand.u32 2147483648, %v2835_v6  ;;  %v2881_v45 = vadd.f32 1.0, %v2110_v25  ;;  %v2114_v46 = vpop.eup %2113  ;;  %v1301_v47 = vmul.f32 %v2108_v19, %v1300_v36  ;;  %vm1304_vm0 = vweird.f32 %v2108_v19 }
  0xcf   :  { %v1539_v53 = vmul.f32 %v2112_v42, %v2833_v5  ;;  %2117 = vrcp.f32 %v2872_v37  ;;  %v1830_v48 = vpack.c.bf16 %v1766_v44, %v1766_v44  ;;  %vm2885_vm1 = vcmp.eq.f32.partialorder %v1547_v26, 8.507059e+37  ;;  %vm1305_vm3 = vmor %vm1303_vm11, %vm1304_vm0  ;;  %v326_v5 = vpop.f32.mrf.mxu2 }
  0xd0   :  { %v1550_v38 = vor.u32 1.1754944e-38, %v1549_v31  ;;  %v834_v33 = vmul.f32 %v2114_v46, %v2835_v6  ;;  %v1302_v50 = vadd.f32 %v2108_v19, %v1301_v47  ;;  %vm2890_vm2 = vcmp.eq.f32.partialorder %v842_v32, 8.507059e+37 }
  0xd1   :  { %v1540_v51 = vsub.f32 1.0, %v1539_v53  ;;  %v1989_v58 = vmul.f32 -1.442695, %v2865_v30  ;;  %1895 = vst.msk [vmem:[%s4179_s4 + $0x48] sm:$0xf] %vm1876_vm6, %v1830_v48  ;;  %v845_v60 = vor.u32 1.1754944e-38, %v844_v52  ;;  %2119 = vrcp.f32 %v2881_v45 }
  0xd2   :  { %v835_v59 = vsub.f32 1.0, %v834_v33  ;;  %v1082_v61 = vand.u32 2147483647, %v2872_v37  ;;  %v1306_v63 = vsel %vm1305_vm3, %v2108_v19, %v1302_v50  ;;  %vm1544_vm4 = vweird.f32 %v2112_v42 }
  0xd3   :  { %v2116_v39 = vpop.eup %2115  ;;  %v1541_v0 = vmul.f32 %v2112_v42, %v1540_v51  ;;  %v1084_v62 = vand.u32 2147483648, %v2872_v37  ;;  %v1311_v1 = vsel %vm2859_vm13, %v1310_v24, %v1306_v63  ;;  %vm839_vm5 = vweird.f32 %v2114_v46  ;;  %vm1545_vm8 = vmor %vm1543_vm14, %vm1544_vm4  ;;  %v288_v63 = vpop.f32.mrf.mxu1 }
  0xd4   :  { %v836_v29 = vmul.f32 %v2114_v46, %v835_v59  ;;  %vm1078_vm7 = vweird.f32 %v2872_v37  ;;  %v1782_v3 = vmul.f32 %v1311_v1, %v2757_v54  ;;  %v2908_v55 = vadd.f32 1.0, %v2116_v39  ;;  %vm840_vm10 = vmor %vm838_vm15, %vm839_vm5  ;;  %v368_v1 = vpop.f32.mrf.mxu3 }
  0xd5   :  { %v2118_v56 = vpop.eup %2117  ;;  %v1542_v4 = vadd.f32 %v2112_v42, %v1541_v0  ;;  %2121 = vpow2.f32 %v1989_v58  ;;  %vm2913_vm9 = vcmp.eq.f32.partialorder %v1082_v61, 8.507059e+37  ;;  %v1322_v40 = vand.u32 2147483647, %v2881_v45  ;;  %v248_v58 = vpop.f32.mrf.mxu0 }
  0xd6   :  { %v837_v8 = vadd.f32 %v2114_v46, %v836_v29  ;;  %v1074_v9 = vmul.f32 %v2118_v56, %v2872_v37  ;;  %v1846_v13 = vpack.c.bf16 %v1782_v3, %v1782_v3  ;;  %v1085_v54 = vor.u32 1.1754944e-38, %v1084_v62 }
  0xd7   :  { %v1546_v41 = vsel %vm1545_vm8, %v2112_v42, %v1542_v4  ;;  %vm1318_vm11 = vweird.f32 %v2881_v45  ;;  %2123 = vrcp.f32 %v2908_v55  ;;  %v2120_v17 = vpop.eup %2119  ;;  %v1324_v20 = vand.u32 2147483648, %v2881_v45 }
  0xd8   :  { %v1551_v18 = vsel %vm2885_vm1, %v1550_v38, %v1546_v41  ;;  %v841_v7 = vsel %vm840_vm10, %v2114_v46, %v837_v8  ;;  %v1075_v19 = vsub.f32 1.0, %v1074_v9  ;;  %1911 = vst.msk [vmem:[%s4179_s4 + $0x88] sm:$0xf] %vm1876_vm6, %v1846_v13  ;;  %vm1079_vm12 = vweird.f32 %v2118_v56 }
  0xd9   :  { %v1798_v6 = vmul.f32 %v1551_v18, %v2773_v14  ;;  %v846_v22 = vsel %vm2890_vm2, %v845_v60, %v841_v7  ;;  %v1314_v23 = vmul.f32 %v2120_v17, %v2881_v45  ;;  %vm1319_vm13 = vweird.f32 %v2120_v17  ;;  %vm1080_vm14 = vmor %vm1078_vm7, %vm1079_vm12 }
  0xda   :  { %v1751_v24 = vmul.f32 %v846_v22, %v2776_v15  ;;  %v1076_v26 = vmul.f32 %v2118_v56, %v1075_v19  ;;  %v1562_v27 = vand.u32 2147483647, %v2908_v55  ;;  %v2937_v25 = vadd.f32 %v2582_v35, %v2854_v21  ;;  %vm1320_vm1 = vmor %vm1318_vm11, %vm1319_vm13 }
  0xdb   :  { %v2122_v28 = vpop.eup %2121  ;;  %v1862_v31 = vpack.c.bf16 %v1798_v6, %v1798_v6  ;;  %v1315_v32 = vsub.f32 1.0, %v1314_v23  ;;  %v436_v14 = vmul.f32 %v2577_v34, %v326_v5  ;;  %v1564_v42 = vand.u32 2147483648, %v2908_v55 }
  0xdc   :  { %v1815_v16 = vpack.c.bf16 %v1751_v24, %v1751_v24  ;;  %v1077_v36 = vadd.f32 %v2118_v56, %v1076_v26  ;;  %v2941_v44 = vadd.f32 1.0, %v2122_v28  ;;  %v2005_v52 = vmul.f32 -1.442695, %v2937_v25 }
  0xdd   :  { %v2124_v15 = vpop.eup %2123  ;;  %1927 = vst.msk [vmem:[%s4179_s4 + $0xc8] sm:$0xf] %vm1876_vm6, %v1862_v31  ;;  %v1316_v21 = vmul.f32 %v2120_v17, %v1315_v32  ;;  %v2952_v46 = vadd.f32 %v2582_v35, %v436_v14  ;;  %v452_v47 = vmul.f32 %v2577_v34, %v366_v12  ;;  %vm2959_vm15 = vcmp.eq.f32.partialorder %v1322_v40, 8.507059e+37 }
  0xde   :  { %1880 = vst.msk [vmem:[%s4179_s4 + $0xc] sm:$0xf] %vm1876_vm6, %v1815_v16  ;;  %v1081_v53 = vsel %vm1080_vm14, %v2118_v56, %v1077_v36  ;;  %v1554_v37 = vmul.f32 %v2124_v15, %v2908_v55  ;;  %2125 = vrcp.f32 %v2941_v44  ;;  %v1325_v33 = vor.u32 1.1754944e-38, %v1324_v20 }
  0xdf   :  { %v1086_v49 = vsel %vm2913_vm9, %v1085_v54, %v1081_v53  ;;  %v1317_v38 = vadd.f32 %v2120_v17, %v1316_v21  ;;  %vm1558_vm0 = vweird.f32 %v2908_v55  ;;  %vm2972_vm2 = vcmp.eq.f32.partialorder %v1562_v27, 8.507059e+37  ;;  %v251_v53 = vpop.f32.mrf.mxu0 }
  0xe0   :  { %v1767_v50 = vmul.f32 %v1086_v49, %v2800_v10  ;;  %v1555_v51 = vsub.f32 1.0, %v1554_v37  ;;  %2127 = vpow2.f32 %v2005_v52  ;;  %v1565_v60 = vor.u32 1.1754944e-38, %v1564_v42  ;;  %v328_v10 = vpop.f32.mrf.mxu2 }
  0xe1   :  { %v1321_v59 = vsel %vm1320_vm1, %v2120_v17, %v1317_v38  ;;  %v2021_v61 = vmul.f32 -1.442695, %v2952_v46  ;;  %v2978_v39 = vadd.f32 %v2582_v35, %v452_v47  ;;  %vm1559_vm3 = vweird.f32 %v2124_v15 }
  0xe2   :  { %v1831_v0 = vpack.c.bf16 %v1767_v50, %v1767_v50  ;;  %v1326_v45 = vsel %vm2959_vm15, %v1325_v33, %v1321_v59  ;;  %v1556_v62 = vmul.f32 %v2124_v15, %v1555_v51  ;;  %v405_v3 = vmul.f32 %v2577_v34, %v248_v58  ;;  %vm1560_vm5 = vmor %vm1558_vm0, %vm1559_vm3 }
  0xe3   :  { %v1783_v29 = vmul.f32 %v1326_v45, %v2807_v43  ;;  %2129 = vpow2.f32 %v2021_v61  ;;  %v2037_v56 = vmul.f32 -1.442695, %v2978_v39  ;;  %vm853_vm4 = vweird.f32 %v2941_v44 }
  0xe4   :  { %v2126_v4 = vpop.eup %2125  ;;  %1896 = vst.msk [vmem:[%s4179_s4 + $0x4c] sm:$0xf] %vm1876_vm6, %v1831_v0  ;;  %v1557_v8 = vadd.f32 %v2124_v15, %v1556_v62  ;;  %v421_v9 = vmul.f32 %v2577_v34, %v288_v63  ;;  %v437_v11 = vmul.f32 %v2577_v34, %v328_v10  ;;  %v453_v13 = vmul.f32 %v2577_v34, %v368_v1  ;;  %v291_v0 = vpop.f32.mrf.mxu1 }
  0xe5   :  { %v1847_v40 = vpack.c.bf16 %v1783_v29, %v1783_v29  ;;  %v849_v43 = vmul.f32 %v2126_v4, %v2941_v44  ;;  %2131 = vpow2.f32 %v2037_v56  ;;  %v2997_v5 = vadd.f32 %v2582_v35, %v405_v3 }
  0xe6   :  { %v2128_v41 = vpop.eup %2127  ;;  %v1561_v54 = vsel %vm1560_vm5, %v2124_v15, %v1557_v8  ;;  %v3000_v17 = vadd.f32 %v2582_v35, %v421_v9  ;;  %v3003_v18 = vadd.f32 %v2582_v35, %v437_v11  ;;  %v857_v19 = vand.u32 2147483647, %v2941_v44 }
  0xe7   :  { %1912 = vst.msk [vmem:[%s4179_s4 + $0x8c] sm:$0xf] %vm1876_vm6, %v1847_v40  ;;  %v1566_v55 = vsel %vm2972_vm2, %v1565_v60, %v1561_v54  ;;  %v850_v7 = vsub.f32 1.0, %v849_v43  ;;  %v3012_v20 = vadd.f32 1.0, %v2128_v41  ;;  %v859_v6 = vand.u32 2147483648, %v2941_v44  ;;  %v253_v41 = vpop.f32.mrf.mxu0 }
  0xe8   :  { %v1799_v12 = vmul.f32 %v1566_v55, %v2831_v2  ;;  %v1990_v22 = vmul.f32 -1.442695, %v2997_v5  ;;  %v2006_v23 = vmul.f32 -1.442695, %v3000_v17  ;;  %vm854_vm7 = vweird.f32 %v2126_v4 }
  0xe9   :  { %v2130_v24 = vpop.eup %2129  ;;  %v851_v26 = vmul.f32 %v2126_v4, %v850_v7  ;;  %2133 = vrcp.f32 %v3012_v20  ;;  %v3020_v27 = vadd.f32 %v2582_v35, %v453_v13  ;;  %v2022_v2 = vmul.f32 -1.442695, %v3003_v18  ;;  %vm855_vm8 = vmor %vm853_vm4, %vm854_vm7 }
  0xea   :  { %v1863_v28 = vpack.c.bf16 %v1799_v12, %v1799_v12  ;;  %v3022_v31 = vadd.f32 1.0, %v2130_v24  ;;  %2135 = vpow2.f32 %v1990_v22  ;;  %v860_v16 = vor.u32 1.1754944e-38, %v859_v6 }
  0xeb   :  { %v2132_v32 = vpop.eup %2131  ;;  %v852_v14 = vadd.f32 %v2126_v4, %v851_v26  ;;  %2137 = vpow2.f32 %v2006_v23  ;;  %v1097_v36 = vand.u32 2147483647, %v3012_v20  ;;  %v1099_v42 = vand.u32 2147483648, %v3012_v20 }
  0xec   :  { %1928 = vst.msk [vmem:[%s4179_s4 + $0xcc] sm:$0xf] %vm1876_vm6, %v1863_v28  ;;  %2139 = vrcp.f32 %v3022_v31  ;;  %vm858_vm9 = vcmp.eq.f32.partialorder %v857_v19, 8.507059e+37  ;;  %v3034_v21 = vadd.f32 1.0, %v2132_v32  ;;  %v2038_v52 = vmul.f32 -1.442695, %v3020_v27 }
  0xed   :  { %v856_v15 = vsel %vm855_vm8, %v2126_v4, %v852_v14  ;;  %2141 = vpow2.f32 %v2022_v2  ;;  %v1337_v37 = vand.u32 2147483647, %v3022_v31  ;;  %v1339_v49 = vand.u32 2147483648, %v3022_v31 }
  0xee   :  { %v861_v47 = vsel %vm858_vm9, %v860_v16, %v856_v15  ;;  %2143 = vrcp.f32 %v3034_v21  ;;  %vm1093_vm10 = vweird.f32 %v3012_v20  ;;  %vm3043_vm11 = vcmp.eq.f32.partialorder %v1097_v36, 8.507059e+37 }
  0xef   :  { %v2134_v48 = vpop.eup %2133  ;;  %v1752_v44 = vmul.f32 %v861_v47, %v2865_v30  ;;  %v1100_v51 = vor.u32 1.1754944e-38, %v1099_v42  ;;  %2145 = vpow2.f32 %v2038_v52  ;;  %v406_v30 = vmul.f32 %v2577_v34, %v251_v53 }
  0xf0   :  { %v2136_v38 = vpop.eup %2135  ;;  %v1089_v33 = vmul.f32 %v2134_v48, %v3012_v20  ;;  %vm1333_vm12 = vweird.f32 %v3022_v31  ;;  %v1577_v63 = vand.u32 2147483647, %v3034_v21  ;;  %vm3059_vm13 = vcmp.eq.f32.partialorder %v1337_v37, 8.507059e+37 }
  0xf1   :  { %v2138_v57 = vpop.eup %2137  ;;  %v1816_v58 = vpack.c.bf16 %v1752_v44, %v1752_v44  ;;  %v3047_v59 = vadd.f32 1.0, %v2136_v38  ;;  %v1340_v1 = vor.u32 1.1754944e-38, %v1339_v49  ;;  %v1579_v29 = vand.u32 2147483648, %v3034_v21  ;;  %v331_v49 = vpop.f32.mrf.mxu2 }
  0xf2   :  { %v2140_v60 = vpop.eup %2139  ;;  %v1090_v61 = vsub.f32 1.0, %v1089_v33  ;;  %v3052_v10 = vadd.f32 1.0, %v2138_v57  ;;  %vm1094_vm14 = vweird.f32 %v2134_v48  ;;  %vm1573_vm15 = vweird.f32 %v3034_v21 }
  0xf3   :  { %1881 = vst.msk [vmem:[%s4179_s4 + $0x10] sm:$0xf] %vm1876_vm6, %v1816_v58  ;;  %v1329_v45 = vmul.f32 %v2140_v60, %v3022_v31  ;;  %2147 = vrcp.f32 %v3047_v59  ;;  %v2142_v56 = vpop.eup %2141  ;;  %v874_v9 = vand.u32 2147483648, %v3047_v59  ;;  %v3069_v11 = vadd.f32 %v2582_v35, %v406_v30  ;;  %vm1095_vm1 = vmor %vm1093_vm10, %vm1094_vm14 }
  0xf4   :  { %v1091_v3 = vmul.f32 %v2134_v48, %v1090_v61  ;;  %2149 = vrcp.f32 %v3052_v10  ;;  %v2144_v4 = vpop.eup %2143  ;;  %v422_v40 = vmul.f32 %v2577_v34, %v291_v0  ;;  %vm3073_vm0 = vcmp.eq.f32.partialorder %v1577_v63, 8.507059e+37 }
  0xf5   :  { %v1330_v8 = vsub.f32 1.0, %v1329_v45  ;;  %v1569_v13 = vmul.f32 %v2144_v4, %v3034_v21  ;;  %v872_v54 = vand.u32 2147483647, %v3047_v59  ;;  %v2146_v55 = vpop.eup %2145  ;;  %vm1334_vm2 = vweird.f32 %v2140_v60 }
  0xf6   :  { %v1092_v43 = vadd.f32 %v2134_v48, %v1091_v3  ;;  %v1580_v19 = vor.u32 1.1754944e-38, %v1579_v29  ;;  %v1112_v35 = vand.u32 2147483647, %v3052_v10  ;;  %vm868_vm3 = vweird.f32 %v3047_v59  ;;  %vm1335_vm7 = vmor %vm1333_vm12, %vm1334_vm2 }
  0xf7   :  { %v1331_v7 = vmul.f32 %v2140_v60, %v1330_v8  ;;  %v1570_v34 = vsub.f32 1.0, %v1569_v13  ;;  %v1114_v6 = vand.u32 2147483648, %v3052_v10  ;;  %v3083_v22 = vadd.f32 1.0, %v2142_v56  ;;  %v371_v8 = vpop.f32.mrf.mxu3 }
  0xf8   :  { %v1096_v12 = vsel %vm1095_vm1, %v2134_v48, %v1092_v43  ;;  %vm1574_vm4 = vweird.f32 %v2144_v4  ;;  %v875_v20 = vor.u32 1.1754944e-38, %v874_v9  ;;  %vm1108_vm5 = vweird.f32 %v3052_v10 }
  0xf9   :  { %v2148_v23 = vpop.eup %2147  ;;  %v1101_v24 = vsel %vm3043_vm11, %v1100_v51, %v1096_v12  ;;  %v1332_v26 = vadd.f32 %v2140_v60, %v1331_v7  ;;  %v1571_v32 = vmul.f32 %v2144_v4, %v1570_v34  ;;  %vm3093_vm8 = vcmp.eq.f32.partialorder %v872_v54, 8.507059e+37  ;;  %vm1575_vm10 = vmor %vm1573_vm15, %vm1574_vm4  ;;  %v3159_v7 = vld [vmem:[%s4177_s2] ss:$0 sm:$0xff]  ;;  %v293_v34 = vpop.f32.mrf.mxu1 }
  0xfa   :  { %v2150_v28 = vpop.eup %2149  ;;  %v1768_v2 = vmul.f32 %v1101_v24, %v2937_v25  ;;  %v864_v14 = vmul.f32 %v2148_v23, %v3047_v59  ;;  %v3097_v36 = vadd.f32 1.0, %v2146_v55  ;;  %vm3100_vm9 = vcmp.eq.f32.partialorder %v1112_v35, 8.507059e+37 }
  0xfb   :  { %v1336_v42 = vsel %vm1335_vm7, %v2140_v60, %v1332_v26  ;;  %v1104_v15 = vmul.f32 %v2150_v28, %v3052_v10  ;;  %2151 = vrcp.f32 %v3083_v22  ;;  %v1572_v47 = vadd.f32 %v2144_v4, %v1571_v32  ;;  %v3124_v60 = vld [vmem:[%s4178_s3] ss:$0 sm:$0xff] }
  0xfc   :  { %v1832_v25 = vpack.c.bf16 %v1768_v2, %v1768_v2  ;;  %v1341_v31 = vsel %vm3059_vm13, %v1340_v1, %v1336_v42  ;;  %v865_v53 = vsub.f32 1.0, %v864_v14  ;;  %vm869_vm11 = vweird.f32 %v2148_v23 }
  0xfd   :  { %v1784_v48 = vmul.f32 %v1341_v31, %v2952_v46  ;;  %v1105_v44 = vsub.f32 1.0, %v1104_v15  ;;  %v1991_v37 = vmul.f32 -1.442695, %v3069_v11  ;;  %v1576_v38 = vsel %vm1575_vm10, %v2144_v4, %v1572_v47  ;;  %vm870_vm13 = vmor %vm868_vm3, %vm869_vm11 }
  0xfe   :  { %1897 = vst.msk [vmem:[%s4179_s4 + $0x50] sm:$0xf] %vm1876_vm6, %v1832_v25  ;;  %v866_v33 = vmul.f32 %v2148_v23, %v865_v53  ;;  %v1354_v50 = vand.u32 2147483648, %v3083_v22  ;;  %2153 = vrcp.f32 %v3097_v36  ;;  %v1581_v21 = vsel %vm3073_vm0, %v1580_v19, %v1576_v38 }
  0xff   :  { %v1848_v46 = vpack.c.bf16 %v1784_v48, %v1784_v48  ;;  %v1106_v51 = vmul.f32 %v2150_v28, %v1105_v44  ;;  %vm1109_vm12 = vweird.f32 %v2150_v28  ;;  %v1800_v57 = vmul.f32 %v1581_v21, %v2978_v39 }
 0x100   :  { %v867_v58 = vadd.f32 %v2148_v23, %v866_v33  ;;  %v1115_v30 = vor.u32 1.1754944e-38, %v1114_v6  ;;  %v3127_v61 = vadd.f32 %v3124_v60, %v422_v40  ;;  %vm1348_vm14 = vweird.f32 %v3083_v22  ;;  %vm1110_vm15 = vmor %vm1108_vm5, %vm1109_vm12 }
 0x101   :  { %v2152_v63 = vpop.eup %2151  ;;  %1913 = vst.msk [vmem:[%s4179_s4 + $0x90] sm:$0xf] %vm1876_vm6, %v1848_v46  ;;  %v1107_v39 = vadd.f32 %v2150_v28, %v1106_v51  ;;  %v1352_v0 = vand.u32 2147483647, %v3083_v22  ;;  %2155 = vpow2.f32 %v1991_v37  ;;  %v1864_v45 = vpack.c.bf16 %v1800_v57, %v1800_v57 }
 0x102   :  { %v871_v62 = vsel %vm870_vm13, %v2148_v23, %v867_v58  ;;  %v1344_v1 = vmul.f32 %v2152_v63, %v3083_v22  ;;  %v1355_v29 = vor.u32 1.1754944e-38, %v1354_v50  ;;  %v1592_v3 = vand.u32 2147483647, %v3097_v36  ;;  %v373_v50 = vpop.f32.mrf.mxu3 }
 0x103   :  { %v876_v56 = vsel %vm3093_vm8, %v875_v20, %v871_v62  ;;  %v1111_v59 = vsel %vm1110_vm15, %v2150_v28, %v1107_v39  ;;  %v1594_v4 = vand.u32 2147483648, %v3097_v36  ;;  %1929 = vst.msk [vmem:[%s4179_s4 + $0xd0] sm:$0xf] %vm1876_vm6, %v1864_v45  ;;  %v2007_v13 = vmul.f32 -1.442695, %v3127_v61  ;;  %v333_v20 = vpop.f32.mrf.mxu2 }
 0x104   :  { %v2154_v9 = vpop.eup %2153  ;;  %v1753_v10 = vmul.f32 %v876_v56, %v2997_v5  ;;  %v1116_v40 = vsel %vm3100_vm9, %v1115_v30, %v1111_v59  ;;  %v1345_v43 = vsub.f32 1.0, %v1344_v1  ;;  %vm1349_vm0 = vweird.f32 %v2152_v63 }
 0x105   :  { %v1769_v54 = vmul.f32 %v1116_v40, %v3000_v17  ;;  %v1584_v55 = vmul.f32 %v2154_v9, %v3097_v36  ;;  %v438_v19 = vmul.f32 %v3159_v7, %v331_v49  ;;  %2157 = vpow2.f32 %v2007_v13  ;;  %vm1350_vm2 = vmor %vm1348_vm14, %vm1349_vm0 }
 0x106   :  { %v1817_v5 = vpack.c.bf16 %v1753_v10, %v1753_v10  ;;  %v1346_v35 = vmul.f32 %v2152_v63, %v1345_v43  ;;  %v454_v12 = vmul.f32 %v3159_v7, %v371_v8  ;;  %v407_v26 = vmul.f32 %v3159_v7, %v253_v41  ;;  %v296_v41 = vpop.f32.mrf.mxu1 }
 0x107   :  { %v2156_v6 = vpop.eup %2155  ;;  %v1833_v23 = vpack.c.bf16 %v1769_v54, %v1769_v54  ;;  %v1585_v24 = vsub.f32 1.0, %v1584_v55  ;;  %v3164_v17 = vadd.f32 %v3124_v60, %v438_v19  ;;  %vm1589_vm1 = vweird.f32 %v2154_v9 }
 0x108   :  { %1882 = vst.msk [vmem:[%s4179_s4 + $0x14] sm:$0xf] %vm1876_vm6, %v1817_v5  ;;  %v1347_v28 = vadd.f32 %v2152_v63, %v1346_v35  ;;  %v3171_v2 = vadd.f32 1.0, %v2156_v6  ;;  %v3174_v32 = vadd.f32 %v3124_v60, %v454_v12  ;;  %v3185_v42 = vadd.f32 %v3124_v60, %v407_v26 }
 0x109   :  { %1898 = vst.msk [vmem:[%s4179_s4 + $0x54] sm:$0xf] %vm1876_vm6, %v1833_v23  ;;  %v1586_v14 = vmul.f32 %v2154_v9, %v1585_v24  ;;  %v2023_v16 = vmul.f32 -1.442695, %v3164_v17  ;;  %v423_v15 = vmul.f32 %v3159_v7, %v293_v34  ;;  %vm1353_vm3 = vcmp.eq.f32.partialorder %v1352_v0, 8.507059e+37 }
 0x10a   :  { %v1351_v52 = vsel %vm1350_vm2, %v2152_v63, %v1347_v28  ;;  %2159 = vrcp.f32 %v3171_v2  ;;  %v439_v25 = vmul.f32 %v3159_v7, %v333_v20  ;;  %vm1588_vm4 = vweird.f32 %v3097_v36 }
 0x10b   :  { %v1356_v31 = vsel %vm1353_vm3, %v1355_v29, %v1351_v52  ;;  %v1587_v47 = vadd.f32 %v2154_v9, %v1586_v14  ;;  %2161 = vpow2.f32 %v2023_v16  ;;  %v2158_v22 = vpop.eup %2157  ;;  %vm1590_vm5 = vmor %vm1588_vm4, %vm1589_vm1  ;;  %v1595_v48 = vor.u32 1.1754944e-38, %v1594_v4 }
 0x10c   :  { %v1785_v53 = vmul.f32 %v1356_v31, %v3003_v18  ;;  %v2039_v44 = vmul.f32 -1.442695, %v3174_v32  ;;  %v1992_v37 = vmul.f32 -1.442695, %v3185_v42  ;;  %vm1593_vm7 = vcmp.eq.f32.partialorder %v1592_v3, 8.507059e+37  ;;  %v256_v3 = vpop.f32.mrf.mxu0 }
 0x10d   :  { %v1591_v49 = vsel %vm1590_vm5, %v2154_v9, %v1587_v47  ;;  %v3195_v38 = vadd.f32 1.0, %v2158_v22  ;;  %v3198_v33 = vadd.f32 %v3124_v60, %v423_v15  ;;  %v3201_v18 = vadd.f32 %v3124_v60, %v439_v25 }
 0x10e   :  { %v1849_v36 = vpack.c.bf16 %v1785_v53, %v1785_v53  ;;  %v1596_v46 = vsel %vm1593_vm7, %v1595_v48, %v1591_v49  ;;  %2163 = vpow2.f32 %v2039_v44  ;;  %v887_v51 = vand.u32 2147483647, %v3171_v2 }
 0x10f   :  { %v1801_v21 = vmul.f32 %v1596_v46, %v3020_v27  ;;  %2165 = vrcp.f32 %v3195_v38  ;;  %v889_v58 = vand.u32 2147483648, %v3171_v2  ;;  %v2008_v30 = vmul.f32 -1.442695, %v3198_v33 }
 0x110   :  { %v2160_v57 = vpop.eup %2159  ;;  %1914 = vst.msk [vmem:[%s4179_s4 + $0x94] sm:$0xf] %vm1876_vm6, %v1849_v36  ;;  %2167 = vpow2.f32 %v1992_v37  ;;  %v455_v63 = vmul.f32 %v3159_v7, %v373_v50  ;;  %v1127_v45 = vand.u32 2147483647, %v3195_v38  ;;  %v1129_v62 = vand.u32 2147483648, %v3195_v38 }
 0x111   :  { %v2162_v39 = vpop.eup %2161  ;;  %v1865_v0 = vpack.c.bf16 %v1801_v21, %v1801_v21  ;;  %v879_v27 = vmul.f32 %v2160_v57, %v3171_v2  ;;  %2169 = vpow2.f32 %v2008_v30  ;;  %v2024_v29 = vmul.f32 -1.442695, %v3201_v18 }
 0x112   :  { %v3216_v1 = vadd.f32 1.0, %v2162_v39  ;;  %vm883_vm8 = vweird.f32 %v3171_v2  ;;  %v3225_v59 = vadd.f32 %v3124_v60, %v455_v63  ;;  %vm3227_vm9 = vcmp.eq.f32.partialorder %v887_v51, 8.507059e+37 }
 0x113   :  { %1930 = vst.msk [vmem:[%s4179_s4 + $0xd4] sm:$0xf] %vm1876_vm6, %v1865_v0  ;;  %v880_v56 = vsub.f32 1.0, %v879_v27  ;;  %v890_v9 = vor.u32 1.1754944e-38, %v889_v58  ;;  %vm1123_vm10 = vweird.f32 %v3195_v38  ;;  %vm884_vm11 = vweird.f32 %v2160_v57 }
 0x114   :  { %v2164_v4 = vpop.eup %2163  ;;  %2171 = vrcp.f32 %v3216_v1  ;;  %v2040_v13 = vmul.f32 -1.442695, %v3225_v59  ;;  %vm3237_vm12 = vcmp.eq.f32.partialorder %v1127_v45, 8.507059e+37  ;;  %v1130_v5 = vor.u32 1.1754944e-38, %v1129_v62  ;;  %vm885_vm13 = vmor %vm883_vm8, %vm884_vm11 }
 0x115   :  { %v2166_v10 = vpop.eup %2165  ;;  %v881_v40 = vmul.f32 %v2160_v57, %v880_v56  ;;  %v3233_v43 = vadd.f32 1.0, %v2164_v4  ;;  %2173 = vpow2.f32 %v2024_v29  ;;  %v408_v35 = vmul.f32 %v3159_v7, %v256_v3 }
 0x116   :  { %v2168_v54 = vpop.eup %2167  ;;  %v1119_v55 = vmul.f32 %v2166_v10, %v3195_v38  ;;  %v1367_v34 = vand.u32 2147483647, %v3216_v1  ;;  %v1369_v6 = vand.u32 2147483648, %v3216_v1  ;;  %vm1124_vm14 = vweird.f32 %v2166_v10 }
 0x117   :  { %v882_v12 = vadd.f32 %v2160_v57, %v881_v40  ;;  %2175 = vrcp.f32 %v3233_v43  ;;  %v2170_v23 = vpop.eup %2169  ;;  %v3248_v26 = vadd.f32 1.0, %v2168_v54  ;;  %v3251_v20 = vmul.f32 %v3159_v7, %v296_v41  ;;  %vm1125_vm2 = vmor %vm1123_vm10, %vm1124_vm14 }
 0x118   :  { %v1120_v24 = vsub.f32 1.0, %v1119_v55  ;;  %vm1363_vm15 = vweird.f32 %v3216_v1  ;;  %v1607_v14 = vand.u32 2147483647, %v3233_v43  ;;  %v3255_v16 = vadd.f32 1.0, %v2170_v23 }
 0x119   :  { %v886_v28 = vsel %vm885_vm13, %v2160_v57, %v882_v12  ;;  %2177 = vpow2.f32 %v2040_v13  ;;  %v1609_v25 = vand.u32 2147483648, %v3233_v43  ;;  %vm3263_vm0 = vcmp.eq.f32.partialorder %v1367_v34, 8.507059e+37 }
 0x11a   :  { %v2172_v15 = vpop.eup %2171  ;;  %v891_v2 = vsel %vm3227_vm9, %v890_v9, %v886_v28  ;;  %v1121_v52 = vmul.f32 %v2166_v10, %v1120_v24  ;;  %2179 = vrcp.f32 %v3248_v26  ;;  %v1370_v53 = vor.u32 1.1754944e-38, %v1369_v6 }
 0x11b   :  { %v1754_v31 = vmul.f32 %v891_v2, %v3069_v11  ;;  %v1359_v47 = vmul.f32 %v2172_v15, %v3216_v1  ;;  %v2174_v48 = vpop.eup %2173  ;;  %vm1603_vm1 = vweird.f32 %v3233_v43  ;;  %2181 = vrcp.f32 %v3255_v16 }
 0x11c   :  { %v1122_v44 = vadd.f32 %v2166_v10, %v1121_v52  ;;  %v3270_v37 = vadd.f32 %v3124_v60, %v408_v35  ;;  %v902_v36 = vand.u32 2147483647, %v3248_v26  ;;  %v904_v46 = vand.u32 2147483648, %v3248_v26 }
 0x11d   :  { %v2176_v49 = vpop.eup %2175  ;;  %v1818_v50 = vpack.c.bf16 %v1754_v31, %v1754_v31  ;;  %v1360_v11 = vsub.f32 1.0, %v1359_v47  ;;  %vm1364_vm3 = vweird.f32 %v2172_v15  ;;  %vm3278_vm4 = vcmp.eq.f32.partialorder %v1607_v14, 8.507059e+37 }
 0x11e   :  { %v1126_v21 = vsel %vm1125_vm2, %v2166_v10, %v1122_v44  ;;  %v1599_v51 = vmul.f32 %v2176_v49, %v3233_v43  ;;  %v1610_v58 = vor.u32 1.1754944e-38, %v1609_v25  ;;  %vm898_vm5 = vweird.f32 %v3248_v26  ;;  %vm1365_vm10 = vmor %vm1363_vm15, %vm1364_vm3  ;;  %v376_v43 = vpop.f32.mrf.mxu3 }
 0x11f   :  { %v2178_v30 = vpop.eup %2177  ;;  %1883 = vst.msk [vmem:[%s4179_s4 + $0x18] sm:$0xf] %vm1876_vm6, %v1818_v50  ;;  %v1131_v38 = vsel %vm3237_vm12, %v1130_v5, %v1126_v21  ;;  %v1361_v63 = vmul.f32 %v2172_v15, %v1360_v11  ;;  %v1142_v39 = vand.u32 2147483647, %v3255_v16  ;;  %vm1604_vm7 = vweird.f32 %v2176_v49  ;;  %v336_v5 = vpop.f32.mrf.mxu2 }
 0x120   :  { %v2180_v0 = vpop.eup %2179  ;;  %v1770_v27 = vmul.f32 %v1131_v38, %v3127_v61  ;;  %v1600_v45 = vsub.f32 1.0, %v1599_v51  ;;  %v3291_v62 = vadd.f32 1.0, %v2174_v48  ;;  %vm3294_vm8 = vcmp.eq.f32.partialorder %v902_v36, 8.507059e+37  ;;  %vm1605_vm12 = vmor %vm1603_vm1, %vm1604_vm7  ;;  %v258_v21 = vpop.f32.mrf.mxu0 }
 0x121   :  { %v1362_v29 = vadd.f32 %v2172_v15, %v1361_v63  ;;  %v894_v56 = vmul.f32 %v2180_v0, %v3248_v26  ;;  %v905_v4 = vor.u32 1.1754944e-38, %v904_v46  ;;  %vm1138_vm9 = vweird.f32 %v3255_v16  ;;  %v2182_v8 = vpop.eup %2181 }
 0x122   :  { %v1834_v9 = vpack.c.bf16 %v1770_v27, %v1770_v27  ;;  %v1601_v61 = vmul.f32 %v2176_v49, %v1600_v45  ;;  %2183 = vrcp.f32 %v3291_v62  ;;  %v3303_v10 = vadd.f32 1.0, %v2178_v30 }
 0x123   :  { %v1366_v40 = vsel %vm1365_vm10, %v2172_v15, %v1362_v29  ;;  %v895_v13 = vsub.f32 1.0, %v894_v56  ;;  %v1134_v41 = vmul.f32 %v2182_v8, %v3255_v16  ;;  %v1144_v54 = vand.u32 2147483648, %v3255_v16 }
 0x124   :  { %1899 = vst.msk [vmem:[%s4179_s4 + $0x58] sm:$0xf] %vm1876_vm6, %v1834_v9  ;;  %v1371_v1 = vsel %vm3263_vm0, %v1370_v53, %v1366_v40  ;;  %v1602_v55 = vadd.f32 %v2176_v49, %v1601_v61  ;;  %vm899_vm11 = vweird.f32 %v2180_v0  ;;  %v1382_v19 = vand.u32 2147483647, %v3291_v62 }
 0x125   :  { %v1786_v35 = vmul.f32 %v1371_v1, %v3164_v17  ;;  %v896_v12 = vmul.f32 %v2180_v0, %v895_v13  ;;  %v1135_v34 = vsub.f32 1.0, %v1134_v41  ;;  %v1384_v6 = vand.u32 2147483648, %v3291_v62  ;;  %vm900_vm15 = vmor %vm898_vm5, %vm899_vm11 }
 0x126   :  { %v1606_v23 = vsel %vm1605_vm12, %v2176_v49, %v1602_v55  ;;  %vm1139_vm13 = vweird.f32 %v2182_v8  ;;  %vm3319_vm14 = vcmp.eq.f32.partialorder %v1142_v39, 8.507059e+37  ;;  %2185 = vrcp.f32 %v3303_v10 }
 0x127   :  { %v1850_v28 = vpack.c.bf16 %v1786_v35, %v1786_v35  ;;  %v1611_v17 = vsel %vm3278_vm4, %v1610_v58, %v1606_v23  ;;  %v897_v14 = vadd.f32 %v2180_v0, %v896_v12  ;;  %v1136_v15 = vmul.f32 %v2182_v8, %v1135_v34  ;;  %vm1140_vm2 = vmor %vm1138_vm9, %vm1139_vm13 }
 0x128   :  { %v2184_v2 = vpop.eup %2183  ;;  %v1802_v52 = vmul.f32 %v1611_v17, %v3174_v32  ;;  %v1145_v25 = vor.u32 1.1754944e-38, %v1144_v54  ;;  %vm1378_vm0 = vweird.f32 %v3291_v62  ;;  %v1385_v31 = vor.u32 1.1754944e-38, %v1384_v6 }
 0x129   :  { %1915 = vst.msk [vmem:[%s4179_s4 + $0x98] sm:$0xf] %vm1876_vm6, %v1850_v28  ;;  %v901_v47 = vsel %vm900_vm15, %v2180_v0, %v897_v14  ;;  %v1137_v22 = vadd.f32 %v2182_v8, %v1136_v15  ;;  %v1374_v53 = vmul.f32 %v2184_v2, %v3291_v62  ;;  %vm3336_vm1 = vcmp.eq.f32.partialorder %v1382_v19, 8.507059e+37  ;;  %v298_v0 = vpop.f32.mrf.mxu1  ;;  %v378_v62 = vpop.f32.mrf.mxu3 }
 0x12a   :  { %v1622_v32 = vand.u32 2147483647, %v3303_v10  ;;  %v1866_v26 = vpack.c.bf16 %v1802_v52, %v1802_v52  ;;  %v906_v44 = vsel %vm3294_vm8, %v905_v4, %v901_v47  ;;  %vm1379_vm3 = vweird.f32 %v2184_v2  ;;  %v261_v14 = vpop.f32.mrf.mxu0 }
 0x12b   :  { %v1624_v49 = vand.u32 2147483648, %v3303_v10  ;;  %v1755_v50 = vmul.f32 %v906_v44, %v3185_v42  ;;  %v1141_v11 = vsel %vm1140_vm2, %v2182_v8, %v1137_v22  ;;  %v1375_v36 = vsub.f32 1.0, %v1374_v53  ;;  %vm1380_vm7 = vmor %vm1378_vm0, %vm1379_vm3 }
 0x12c   :  { %vm1618_vm4 = vweird.f32 %v3303_v10  ;;  %v1993_v46 = vmul.f32 -1.442695, %v3270_v37  ;;  %v2186_v51 = vpop.eup %2185  ;;  %1931 = vst.msk [vmem:[%s4179_s4 + $0xd8] sm:$0xf] %vm1876_vm6, %v1866_v26  ;;  %v1146_v16 = vsel %vm3319_vm14, %v1145_v25, %v1141_v11  ;;  %v3358_v57 = vadd.f32 %v3124_v60, %v3251_v20  ;;  %v338_v20 = vpop.f32.mrf.mxu2 }
 0x12d   :  { %v440_v42 = vmul.f32 %v3159_v7, %v336_v5  ;;  %v456_v58 = vmul.f32 %v3159_v7, %v376_v43  ;;  %v1819_v30 = vpack.c.bf16 %v1755_v50, %v1755_v50  ;;  %v1771_v38 = vmul.f32 %v1146_v16, %v3198_v33 }
 0x12e   :  { %v1376_v63 = vmul.f32 %v2184_v2, %v1375_v36  ;;  %v1614_v39 = vmul.f32 %v2186_v51, %v3303_v10  ;;  %vm1619_vm5 = vweird.f32 %v2186_v51  ;;  %2187 = vpow2.f32 %v1993_v46 }
 0x12f   :  { %v2009_v27 = vmul.f32 -1.442695, %v3358_v57  ;;  %v3366_v45 = vadd.f32 %v3124_v60, %v440_v42  ;;  %1884 = vst.msk [vmem:[%s4179_s4 + $0x1c] sm:$0xf] %vm1876_vm6, %v1819_v30  ;;  %v1835_v29 = vpack.c.bf16 %v1771_v38, %v1771_v38  ;;  %v3373_v3 = vadd.f32 %v3124_v60, %v456_v58  ;;  %vm1620_vm9 = vmor %vm1618_vm4, %vm1619_vm5 }
 0x130   :  { %v1377_v56 = vadd.f32 %v2184_v2, %v1376_v63  ;;  %v1615_v33 = vsub.f32 1.0, %v1614_v39  ;;  %v409_v8 = vmul.f32 %v3159_v7, %v258_v21  ;;  %v425_v9 = vmul.f32 %v3159_v7, %v298_v0 }
 0x131   :  { %2189 = vpow2.f32 %v2009_v27  ;;  %v2025_v4 = vmul.f32 -1.442695, %v3366_v45  ;;  %1900 = vst.msk [vmem:[%s4179_s4 + $0x5c] sm:$0xf] %vm1876_vm6, %v1835_v29  ;;  %v2041_v13 = vmul.f32 -1.442695, %v3373_v3  ;;  %v441_v41 = vmul.f32 %v3159_v7, %v338_v20 }
 0x132   :  { %v1381_v61 = vsel %vm1380_vm7, %v2184_v2, %v1377_v56  ;;  %v1616_v40 = vmul.f32 %v2186_v51, %v1615_v33  ;;  %v3390_v1 = vadd.f32 %v3124_v60, %v409_v8  ;;  %v3393_v55 = vadd.f32 %v3124_v60, %v425_v9 }
 0x133   :  { %v1386_v54 = vsel %vm3336_vm1, %v1385_v31, %v1381_v61  ;;  %2191 = vpow2.f32 %v2025_v4  ;;  %vm1623_vm8 = vcmp.eq.f32.partialorder %v1622_v32, 8.507059e+37  ;;  %v1625_v12 = vor.u32 1.1754944e-38, %v1624_v49 }
 0x134   :  { %v1787_v19 = vmul.f32 %v1386_v54, %v3201_v18  ;;  %v1617_v5 = vadd.f32 %v2186_v51, %v1616_v40  ;;  %2193 = vpow2.f32 %v2041_v13  ;;  %v2188_v35 = vpop.eup %2187  ;;  %v1994_v34 = vmul.f32 -1.442695, %v3390_v1 }
 0x135   :  { %v3401_v6 = vadd.f32 %v3124_v60, %v441_v41  ;;  %v457_v23 = vmul.f32 %v3159_v7, %v378_v62  ;;  %v3404_v17 = vadd.f32 1.0, %v2188_v35  ;;  %v2010_v18 = vmul.f32 -1.442695, %v3393_v55 }
 0x136   :  { %v1851_v24 = vpack.c.bf16 %v1787_v19, %v1787_v19  ;;  %v1621_v28 = vsel %vm1620_vm9, %v2186_v51, %v1617_v5  ;;  %2195 = vpow2.f32 %v1994_v34  ;;  %v410_v47 = vmul.f32 %v3159_v7, %v261_v14  ;;  %v263_v14 = vpop.f32.mrf.mxu0 }
 0x137   :  { %v2190_v15 = vpop.eup %2189  ;;  %v1626_v43 = vsel %vm1623_vm8, %v1625_v12, %v1621_v28  ;;  %v3408_v10 = vadd.f32 %v3124_v60, %v457_v23  ;;  %2197 = vrcp.f32 %v3404_v17  ;;  %v2026_v31 = vmul.f32 -1.442695, %v3401_v6 }
 0x138   :  { %1916 = vst.msk [vmem:[%s4179_s4 + $0x9c] sm:$0xf] %vm1876_vm6, %v1851_v24  ;;  %v1803_v2 = vmul.f32 %v1626_v43, %v3225_v59  ;;  %v3416_v25 = vadd.f32 1.0, %v2190_v15  ;;  %2199 = vpow2.f32 %v2010_v18  ;;  %v917_v59 = vand.u32 2147483647, %v3404_v17 }
 0x139   :  { %v2192_v52 = vpop.eup %2191  ;;  %v2042_v32 = vmul.f32 -1.442695, %v3408_v10  ;;  %v919_v26 = vand.u32 2147483648, %v3404_v17  ;;  %v3435_v11 = vadd.f32 %v3124_v60, %v410_v47  ;;  %vm913_vm10 = vweird.f32 %v3404_v17 }
 0x13a   :  { %v2194_v22 = vpop.eup %2193  ;;  %v1867_v53 = vpack.c.bf16 %v1803_v2, %v1803_v2  ;;  %v3420_v48 = vadd.f32 1.0, %v2192_v52  ;;  %2201 = vrcp.f32 %v3416_v25  ;;  %v1159_v49 = vand.u32 2147483648, %v3416_v25 }
 0x13b   :  { %v3432_v50 = vadd.f32 1.0, %v2194_v22  ;;  %v1157_v46 = vand.u32 2147483647, %v3416_v25  ;;  %vm3445_vm11 = vcmp.eq.f32.partialorder %v917_v59, 8.507059e+37  ;;  %v920_v38 = vor.u32 1.1754944e-38, %v919_v26 }
 0x13c   :  { %1932 = vst.msk [vmem:[%s4179_s4 + $0xdc] sm:$0xf] %vm1876_vm6, %v1867_v53  ;;  %2203 = vrcp.f32 %v3420_v48  ;;  %v2196_v44 = vpop.eup %2195  ;;  %v1399_v21 = vand.u32 2147483648, %v3420_v48  ;;  %v1397_v42 = vand.u32 2147483647, %v3420_v48  ;;  %vm1153_vm12 = vweird.f32 %v3416_v25 }
 0x13d   :  { %2205 = vpow2.f32 %v2026_v31  ;;  %v2198_v36 = vpop.eup %2197  ;;  %v3439_v51 = vadd.f32 1.0, %v2196_v44  ;;  %v1160_v0 = vor.u32 1.1754944e-38, %v1159_v49  ;;  %vm1393_vm13 = vweird.f32 %v3420_v48 }
 0x13e   :  { %2207 = vpow2.f32 %v2042_v32  ;;  %v909_v16 = vmul.f32 %v2198_v36, %v3404_v17  ;;  %v2200_v58 = vpop.eup %2199  ;;  %v1639_v27 = vand.u32 2147483648, %v3432_v50  ;;  %v1995_v20 = vmul.f32 -1.442695, %v3435_v11 }
 0x13f   :  { %2209 = vrcp.f32 %v3432_v50  ;;  %vm914_vm14 = vweird.f32 %v2198_v36  ;;  %vm3455_vm15 = vcmp.eq.f32.partialorder %v1157_v46, 8.507059e+37  ;;  %v1400_v4 = vor.u32 1.1754944e-38, %v1399_v21 }
 0x140   :  { %2211 = vrcp.f32 %v3439_v51  ;;  %v2202_v63 = vpop.eup %2201  ;;  %v910_v39 = vsub.f32 1.0, %v909_v16  ;;  %v1637_v8 = vand.u32 2147483647, %v3432_v50  ;;  %vm3461_vm0 = vcmp.eq.f32.partialorder %v1397_v42, 8.507059e+37  ;;  %vm915_vm5 = vmor %vm913_vm10, %vm914_vm14 }
 0x141   :  { %v1149_v56 = vmul.f32 %v2202_v63, %v3416_v25  ;;  %v932_v41 = vand.u32 2147483647, %v3439_v51  ;;  %v934_v62 = vand.u32 2147483648, %v3439_v51  ;;  %vm1154_vm1 = vweird.f32 %v2202_v63  ;;  %v301_v25 = vpop.f32.mrf.mxu1 }
 0x142   :  { %v2204_v29 = vpop.eup %2203  ;;  %v911_v61 = vmul.f32 %v2198_v36, %v910_v39  ;;  %vm1633_vm2 = vweird.f32 %v3432_v50  ;;  %v3468_v5 = vadd.f32 1.0, %v2200_v58  ;;  %v1640_v23 = vor.u32 1.1754944e-38, %v1639_v27  ;;  %vm1155_vm9 = vmor %vm1153_vm12, %vm1154_vm1 }
 0x143   :  { %v2206_v9 = vpop.eup %2205  ;;  %v1389_v40 = vmul.f32 %v2204_v29, %v3420_v48  ;;  %v1150_v19 = vsub.f32 1.0, %v1149_v56  ;;  %vm1394_vm3 = vweird.f32 %v2204_v29  ;;  %vm928_vm4 = vweird.f32 %v3439_v51 }
 0x144   :  { %v2208_v54 = vpop.eup %2207  ;;  %v912_v12 = vadd.f32 %v2198_v36, %v911_v61  ;;  %vm3475_vm7 = vcmp.eq.f32.partialorder %v1637_v8, 8.507059e+37  ;;  %2213 = vrcp.f32 %v3468_v5  ;;  %v3480_v15 = vadd.f32 1.0, %v2206_v9  ;;  %vm1395_vm14 = vmor %vm1393_vm13, %vm1394_vm3 }
 0x145   :  { %v2210_v35 = vpop.eup %2209  ;;  %v1390_v34 = vsub.f32 1.0, %v1389_v40  ;;  %v1151_v28 = vmul.f32 %v2202_v63, %v1150_v19  ;;  %vm3483_vm8 = vcmp.eq.f32.partialorder %v932_v41, 8.507059e+37  ;;  %v935_v17 = vor.u32 1.1754944e-38, %v934_v62 }
 0x146   :  { %v2212_v24 = vpop.eup %2211  ;;  %v1629_v18 = vmul.f32 %v2210_v35, %v3432_v50  ;;  %v916_v43 = vsel %vm915_vm5, %v2198_v36, %v912_v12  ;;  %2215 = vpow2.f32 %v1995_v20  ;;  %vm1634_vm10 = vweird.f32 %v2210_v35 }
 0x147   :  { %v1391_v2 = vmul.f32 %v2204_v29, %v1390_v34  ;;  %v924_v52 = vmul.f32 %v2212_v24, %v3439_v51  ;;  %v921_v47 = vsel %vm3445_vm11, %v920_v38, %v916_v43  ;;  %v1152_v22 = vadd.f32 %v2202_v63, %v1151_v28  ;;  %vm1635_vm11 = vmor %vm1633_vm2, %vm1634_vm10 }
 0x148   :  { %v1630_v53 = vsub.f32 1.0, %v1629_v18  ;;  %v1756_v32 = vmul.f32 %v921_v47, %v3270_v37  ;;  %vm929_vm5 = vweird.f32 %v2212_v24  ;;  %2217 = vrcp.f32 %v3480_v15 }
 0x149   :  { %v1392_v59 = vadd.f32 %v2204_v29, %v1391_v2  ;;  %v925_v26 = vsub.f32 1.0, %v924_v52  ;;  %v1156_v44 = vsel %vm1155_vm9, %v2202_v63, %v1152_v22  ;;  %v1172_v48 = vand.u32 2147483647, %v3468_v5  ;;  %vm930_vm12 = vmor %vm928_vm4, %vm929_vm5  ;;  %v303_v31 = vpop.f32.mrf.mxu1 }
 0x14a   :  { %v1631_v49 = vmul.f32 %v2210_v35, %v1630_v53  ;;  %v1820_v36 = vpack.c.bf16 %v1756_v32, %v1756_v32  ;;  %v1161_v37 = vsel %vm3455_vm15, %v1160_v0, %v1156_v44  ;;  %v2214_v16 = vpop.eup %2213  ;;  %v1174_v39 = vand.u32 2147483648, %v3468_v5 }
 0x14b   :  { %v1396_v46 = vsel %vm1395_vm14, %v2204_v29, %v1392_v59  ;;  %v926_v21 = vmul.f32 %v2212_v24, %v925_v26  ;;  %v1772_v42 = vmul.f32 %v1161_v37, %v3358_v57  ;;  %v1164_v57 = vmul.f32 %v2214_v16, %v3468_v5 }
 0x14c   :  { %v1401_v58 = vsel %vm3461_vm0, %v1400_v4, %v1396_v46  ;;  %v1632_v30 = vadd.f32 %v2210_v35, %v1631_v49  ;;  %1885 = vst.msk [vmem:[%s4179_s4 + $0x20] sm:$0xf] %vm1876_vm6, %v1820_v36  ;;  %v2216_v0 = vpop.eup %2215  ;;  %vm1168_vm13 = vweird.f32 %v3468_v5  ;;  %v3517_v29 = vadd.f32 1.0, %v2208_v54  ;;  %v341_v4 = vpop.f32.mrf.mxu2 }
 0x14d   :  { %v1788_v38 = vmul.f32 %v1401_v58, %v3366_v45  ;;  %v927_v63 = vadd.f32 %v2212_v24, %v926_v21  ;;  %v1836_v27 = vpack.c.bf16 %v1772_v42, %v1772_v42  ;;  %v1165_v33 = vsub.f32 1.0, %v1164_v57 }
 0x14e   :  { %v1636_v20 = vsel %vm1635_vm11, %v2210_v35, %v1632_v30  ;;  %v2218_v8 = vpop.eup %2217  ;;  %vm1169_vm15 = vweird.f32 %v2214_v16  ;;  %vm3528_vm0 = vcmp.eq.f32.partialorder %v1172_v48, 8.507059e+37  ;;  %v1175_v41 = vor.u32 1.1754944e-38, %v1174_v39  ;;  %v381_v35 = vpop.f32.mrf.mxu3 }
 0x14f   :  { %v1852_v45 = vpack.c.bf16 %v1788_v38, %v1788_v38  ;;  %v1641_v50 = vsel %vm3475_vm7, %v1640_v23, %v1636_v20  ;;  %v931_v56 = vsel %vm930_vm12, %v2212_v24, %v927_v63  ;;  %1901 = vst.msk [vmem:[%s4179_s4 + $0x60] sm:$0xf] %vm1876_vm6, %v1836_v27  ;;  %v1166_v13 = vmul.f32 %v2214_v16, %v1165_v33  ;;  %vm1170_vm2 = vmor %vm1168_vm13, %vm1169_vm15 }
 0x150   :  { %v1804_v51 = vmul.f32 %v1641_v50, %v3373_v3  ;;  %v936_v9 = vsel %vm3483_vm8, %v935_v17, %v931_v56  ;;  %v1404_v62 = vmul.f32 %v2218_v8, %v3480_v15  ;;  %v1412_v54 = vand.u32 2147483647, %v3480_v15 }
 0x151   :  { %1917 = vst.msk [vmem:[%s4179_s4 + $0xa0] sm:$0xf] %vm1876_vm6, %v1852_v45  ;;  %v1757_v40 = vmul.f32 %v936_v9, %v3390_v1  ;;  %v1414_v19 = vand.u32 2147483648, %v3480_v15  ;;  %2219 = vrcp.f32 %v3517_v29  ;;  %v1167_v34 = vadd.f32 %v2214_v16, %v1166_v13  ;;  %v306_v61 = vpop.f32.mrf.mxu1 }
 0x152   :  { %v1868_v3 = vpack.c.bf16 %v1804_v51, %v1804_v51  ;;  %v1405_v23 = vsub.f32 1.0, %v1404_v62  ;;  %vm1409_vm1 = vweird.f32 %v2218_v8  ;;  %v1652_v1 = vand.u32 2147483647, %v3517_v29 }
 0x153   :  { %v1821_v12 = vpack.c.bf16 %v1757_v40, %v1757_v40  ;;  %v1654_v24 = vand.u32 2147483648, %v3517_v29  ;;  %v3550_v28 = vadd.f32 1.0, %v2216_v0  ;;  %v426_v18 = vmul.f32 %v3159_v7, %v301_v25 }
 0x154   :  { %1933 = vst.msk [vmem:[%s4179_s4 + $0xe0] sm:$0xf] %vm1876_vm6, %v1868_v3  ;;  %v1171_v43 = vsel %vm1170_vm2, %v2214_v16, %v1167_v34  ;;  %v1406_v2 = vmul.f32 %v2218_v8, %v1405_v23  ;;  %v442_v52 = vmul.f32 %v3159_v7, %v341_v4  ;;  %v458_v5 = vmul.f32 %v3159_v7, %v381_v35  ;;  %v343_v46 = vpop.f32.mrf.mxu2  ;;  %v266_v4 = vpop.f32.mrf.mxu0 }
 0x155   :  { %1886 = vst.msk [vmem:[%s4179_s4 + $0x24] sm:$0xf] %vm1876_vm6, %v1821_v12  ;;  %v1176_v17 = vsel %vm3528_vm0, %v1175_v41, %v1171_v43  ;;  %vm1408_vm3 = vweird.f32 %v3480_v15  ;;  %2221 = vrcp.f32 %v3550_v28  ;;  %vm1413_vm4 = vcmp.eq.f32.partialorder %v1412_v54, 8.507059e+37 }
 0x156   :  { %v1773_v47 = vmul.f32 %v1176_v17, %v3393_v55  ;;  %v1407_v22 = vadd.f32 %v2218_v8, %v1406_v2  ;;  %v1415_v53 = vor.u32 1.1754944e-38, %v1414_v19  ;;  %vm1410_vm7 = vmor %vm1408_vm3, %vm1409_vm1  ;;  %vm1648_vm8 = vweird.f32 %v3517_v29  ;;  %v383_v27 = vpop.f32.mrf.mxu3 }
 0x157   :  { %v2220_v32 = vpop.eup %2219  ;;  %v3567_v59 = vadd.f32 %v3124_v60, %v426_v18  ;;  %v3570_v26 = vadd.f32 %v3124_v60, %v442_v52  ;;  %v3573_v15 = vadd.f32 %v3124_v60, %v458_v5  ;;  %vm3576_vm9 = vcmp.eq.f32.partialorder %v1652_v1, 8.507059e+37 }
 0x158   :  { %v1837_v44 = vpack.c.bf16 %v1773_v47, %v1773_v47  ;;  %v1411_v49 = vsel %vm1410_vm7, %v2218_v8, %v1407_v22  ;;  %v1644_v55 = vmul.f32 %v2220_v32, %v3517_v29  ;;  %v1655_v37 = vor.u32 1.1754944e-38, %v1654_v24 }
 0x159   :  { %v1416_v21 = vsel %vm1413_vm4, %v1415_v53, %v1411_v49  ;;  %v947_v25 = vand.u32 2147483647, %v3550_v28  ;;  %v949_v16 = vand.u32 2147483648, %v3550_v28  ;;  %v2011_v42 = vmul.f32 -1.442695, %v3567_v59 }
 0x15a   :  { %1902 = vst.msk [vmem:[%s4179_s4 + $0x64] sm:$0xf] %vm1876_vm6, %v1837_v44  ;;  %v1789_v58 = vmul.f32 %v1416_v21, %v3401_v6  ;;  %v1645_v30 = vsub.f32 1.0, %v1644_v55  ;;  %v2027_v48 = vmul.f32 -1.442695, %v3570_v26  ;;  %v411_v38 = vmul.f32 %v3159_v7, %v263_v14 }
 0x15b   :  { %v2222_v63 = vpop.eup %2221  ;;  %2223 = vpow2.f32 %v2011_v42  ;;  %v2043_v57 = vmul.f32 -1.442695, %v3573_v15  ;;  %v427_v39 = vmul.f32 %v3159_v7, %v303_v31  ;;  %v443_v0 = vmul.f32 %v3159_v7, %v343_v46 }
 0x15c   :  { %v1853_v20 = vpack.c.bf16 %v1789_v58, %v1789_v58  ;;  %v1646_v45 = vmul.f32 %v2220_v32, %v1645_v30  ;;  %vm1649_vm10 = vweird.f32 %v2220_v32  ;;  %v939_v50 = vmul.f32 %v2222_v63, %v3550_v28 }
 0x15d   :  { %2225 = vpow2.f32 %v2027_v48  ;;  %v3595_v6 = vadd.f32 %v3124_v60, %v411_v38  ;;  %v3598_v56 = vadd.f32 %v3124_v60, %v427_v39  ;;  %v3601_v33 = vadd.f32 %v3124_v60, %v443_v0  ;;  %vm1650_vm14 = vmor %vm1648_vm8, %vm1649_vm10 }
 0x15e   :  { %1918 = vst.msk [vmem:[%s4179_s4 + $0xa4] sm:$0xf] %vm1876_vm6, %v1853_v20  ;;  %v1647_v8 = vadd.f32 %v2220_v32, %v1646_v45  ;;  %v940_v51 = vsub.f32 1.0, %v939_v50  ;;  %2227 = vpow2.f32 %v2043_v57  ;;  %v459_v9 = vmul.f32 %v3159_v7, %v383_v27  ;;  %v386_v58 = vpop.f32.mrf.mxu3 }
 0x15f   :  { %vm943_vm5 = vweird.f32 %v3550_v28  ;;  %v1996_v40 = vmul.f32 -1.442695, %v3595_v6  ;;  %v2012_v13 = vmul.f32 -1.442695, %v3598_v56  ;;  %v2028_v41 = vmul.f32 -1.442695, %v3601_v33  ;;  %v346_v28 = vpop.f32.mrf.mxu2 }
 0x160   :  { %v1651_v62 = vsel %vm1650_vm14, %v2220_v32, %v1647_v8  ;;  %v941_v3 = vmul.f32 %v2222_v63, %v940_v51  ;;  %vm944_vm11 = vweird.f32 %v2222_v63  ;;  %v412_v54 = vmul.f32 %v3159_v7, %v266_v4 }
 0x161   :  { %v2224_v19 = vpop.eup %2223  ;;  %v1656_v35 = vsel %vm3576_vm9, %v1655_v37, %v1651_v62  ;;  %2229 = vpow2.f32 %v1996_v40  ;;  %v3618_v29 = vadd.f32 %v3124_v60, %v459_v9  ;;  %v428_v12 = vmul.f32 %v3159_v7, %v306_v61  ;;  %vm945_vm12 = vmor %vm943_vm5, %vm944_vm11 }
 0x162   :  { %v1805_v34 = vmul.f32 %v1656_v35, %v3408_v10  ;;  %v942_v23 = vadd.f32 %v2222_v63, %v941_v3  ;;  %v3622_v1 = vadd.f32 1.0, %v2224_v19  ;;  %2231 = vpow2.f32 %v2012_v13 }
 0x163   :  { %v2226_v24 = vpop.eup %2225  ;;  %vm948_vm13 = vcmp.eq.f32.partialorder %v947_v25, 8.507059e+37  ;;  %v950_v18 = vor.u32 1.1754944e-38, %v949_v16  ;;  %2233 = vpow2.f32 %v2028_v41  ;;  %v3628_v52 = vadd.f32 %v3124_v60, %v412_v54 }
 0x164   :  { %v2228_v14 = vpop.eup %2227  ;;  %v1869_v43 = vpack.c.bf16 %v1805_v34, %v1805_v34  ;;  %v946_v2 = vsel %vm945_vm12, %v2222_v63, %v942_v23  ;;  %2235 = vrcp.f32 %v3622_v1  ;;  %v3630_v5 = vadd.f32 1.0, %v2226_v24 }
 0x165   :  { %v951_v10 = vsel %vm948_vm13, %v950_v18, %v946_v2  ;;  %v2044_v31 = vmul.f32 -1.442695, %v3618_v29  ;;  %v3634_v17 = vadd.f32 %v3124_v60, %v428_v12  ;;  %v3641_v22 = vadd.f32 1.0, %v2228_v14  ;;  %v3781_v14 = vld [vmem:[%s4178_s3] ss:$0 sm:$0xff] }
 0x166   :  { %1934 = vst.msk [vmem:[%s4179_s4 + $0xe4] sm:$0xf] %vm1876_vm6, %v1869_v43  ;;  %v1758_v47 = vmul.f32 %v951_v10, %v3435_v11  ;;  %v1187_v32 = vand.u32 2147483647, %v3622_v1  ;;  %v1189_v44 = vand.u32 2147483648, %v3622_v1  ;;  %2237 = vrcp.f32 %v3630_v5 }
 0x167   :  { %v2230_v53 = vpop.eup %2229  ;;  %2239 = vrcp.f32 %v3641_v22  ;;  %v3648_v55 = vmul.f32 %v3159_v7, %v346_v28  ;;  %v1997_v11 = vmul.f32 -1.442695, %v3628_v52  ;;  %v3654_v46 = vmul.f32 -1.442695, %v3634_v17 }
 0x168   :  { %v2232_v49 = vpop.eup %2231  ;;  %v1822_v60 = vpack.c.bf16 %v1758_v47, %v1758_v47  ;;  %v3650_v37 = vadd.f32 1.0, %v2230_v53  ;;  %2241 = vpow2.f32 %v2044_v31  ;;  %vm1183_vm15 = vweird.f32 %v3622_v1 }
 0x169   :  { %v2234_v36 = vpop.eup %2233  ;;  %v1427_v7 = vand.u32 2147483647, %v3630_v5  ;;  %v1429_v25 = vand.u32 2147483648, %v3630_v5  ;;  %v3663_v16 = vadd.f32 1.0, %v2232_v49  ;;  %vm3666_vm0 = vcmp.eq.f32.partialorder %v1187_v32, 8.507059e+37 }
 0x16a   :  { %v2236_v21 = vpop.eup %2235  ;;  %1887 = vst.msk [vmem:[%s4179_s4 + $0x28] sm:$0xf] %vm1876_vm6, %v1822_v60  ;;  %v1190_v30 = vor.u32 1.1754944e-38, %v1189_v44  ;;  %v1667_v48 = vand.u32 2147483647, %v3641_v22  ;;  %vm1423_vm1 = vweird.f32 %v3630_v5  ;;  %v1669_v38 = vand.u32 2147483648, %v3641_v22 }
 0x16b   :  { %v1179_v42 = vmul.f32 %v2236_v21, %v3622_v1  ;;  %2243 = vrcp.f32 %v3650_v37  ;;  %v3674_v63 = vadd.f32 1.0, %v2234_v36  ;;  %vm1663_vm2 = vweird.f32 %v3641_v22 }
 0x16c   :  { %v2238_v57 = vpop.eup %2237  ;;  %v964_v0 = vand.u32 2147483648, %v3650_v37  ;;  %2245 = vrcp.f32 %v3663_v16  ;;  %vm1184_vm3 = vweird.f32 %v2236_v21  ;;  %vm3680_vm4 = vcmp.eq.f32.partialorder %v1427_v7, 8.507059e+37 }
 0x16d   :  { %v1180_v39 = vsub.f32 1.0, %v1179_v42  ;;  %v2240_v27 = vpop.eup %2239  ;;  %v1419_v20 = vmul.f32 %v2238_v57, %v3630_v5  ;;  %v1430_v50 = vor.u32 1.1754944e-38, %v1429_v25  ;;  %vm3685_vm7 = vcmp.eq.f32.partialorder %v1667_v48, 8.507059e+37  ;;  %vm1185_vm10 = vmor %vm1183_vm15, %vm1184_vm3 }
 0x16e   :  { %v2242_v4 = vpop.eup %2241  ;;  %v1659_v51 = vmul.f32 %v2240_v27, %v3641_v22  ;;  %v962_v61 = vand.u32 2147483647, %v3650_v37  ;;  %v1670_v13 = vor.u32 1.1754944e-38, %v1669_v38  ;;  %v1202_v41 = vand.u32 2147483647, %v3663_v16 }
 0x16f   :  { %v1181_v8 = vmul.f32 %v2236_v21, %v1180_v39  ;;  %v1420_v40 = vsub.f32 1.0, %v1419_v20  ;;  %2247 = vrcp.f32 %v3674_v63  ;;  %vm1424_vm8 = vweird.f32 %v2238_v57 }
 0x170   :  { %v1660_v3 = vsub.f32 1.0, %v1659_v51  ;;  %vm958_vm9 = vweird.f32 %v3650_v37  ;;  %v965_v54 = vor.u32 1.1754944e-38, %v964_v0  ;;  %vm1664_vm14 = vweird.f32 %v2240_v27  ;;  %vm1425_vm13 = vmor %vm1423_vm1, %vm1424_vm8 }
 0x171   :  { %v1182_v62 = vadd.f32 %v2236_v21, %v1181_v8  ;;  %v2244_v19 = vpop.eup %2243  ;;  %v1421_v35 = vmul.f32 %v2238_v57, %v1420_v40  ;;  %vm1198_vm5 = vweird.f32 %v3663_v16  ;;  %v3697_v12 = vadd.f32 1.0, %v2242_v4  ;;  %v268_v4 = vpop.f32.mrf.mxu0 }
 0x172   :  { %2249 = vpow2.f32 %v1997_v11  ;;  %v2246_v34 = vpop.eup %2245  ;;  %v1661_v24 = vmul.f32 %v2240_v27, %v1660_v3  ;;  %v954_v18 = vmul.f32 %v2244_v19, %v3650_v37  ;;  %vm3700_vm11 = vcmp.eq.f32.partialorder %v962_v61, 8.507059e+37 }
 0x173   :  { %v1186_v23 = vsel %vm1185_vm10, %v2236_v21, %v1182_v62  ;;  %v1204_v43 = vand.u32 2147483648, %v3663_v16  ;;  %v1422_v2 = vadd.f32 %v2238_v57, %v1421_v35  ;;  %v1194_v10 = vmul.f32 %v2246_v34, %v3663_v16 }
 0x174   :  { %v1191_v1 = vsel %vm3666_vm0, %v1190_v30, %v1186_v23  ;;  %vm3708_vm12 = vcmp.eq.f32.partialorder %v1202_v41, 8.507059e+37  ;;  %v1442_v28 = vand.u32 2147483647, %v3674_v63  ;;  %v1662_v53 = vadd.f32 %v2240_v27, %v1661_v24  ;;  %vm1665_vm0 = vmor %vm1663_vm2, %vm1664_vm14  ;;  %v348_v23 = vpop.f32.mrf.mxu2 }
 0x175   :  { %v1774_v47 = vmul.f32 %v1191_v1, %v3567_v59  ;;  %v955_v32 = vsub.f32 1.0, %v954_v18  ;;  %vm959_vm15 = vweird.f32 %v2244_v19  ;;  %v2248_v44 = vpop.eup %2247  ;;  %v1426_v49 = vsel %vm1425_vm13, %v2238_v57, %v1422_v2  ;;  %v3796_v1 = vld [vmem:[%s4177_s2] ss:$0 sm:$0xff] }
 0x176   :  { %v1195_v60 = vsub.f32 1.0, %v1194_v10  ;;  %vm1199_vm3 = vweird.f32 %v2246_v34  ;;  %vm1438_vm10 = vweird.f32 %v3674_v63  ;;  %2251 = vrcp.f32 %v3697_v12  ;;  %vm960_vm1 = vmor %vm958_vm9, %vm959_vm15 }
 0x177   :  { %v1838_v59 = vpack.c.bf16 %v1774_v47, %v1774_v47  ;;  %v1431_v5 = vsel %vm3680_vm4, %v1430_v50, %v1426_v49  ;;  %v1666_v36 = vsel %vm1665_vm0, %v2240_v27, %v1662_v53  ;;  %v956_v11 = vmul.f32 %v2244_v19, %v955_v32  ;;  %vm1200_vm4 = vmor %vm1198_vm5, %vm1199_vm3 }
 0x178   :  { %v2250_v21 = vpop.eup %2249  ;;  %v1790_v7 = vmul.f32 %v1431_v5, %v3570_v26  ;;  %v1671_v25 = vsel %vm3685_vm7, %v1670_v13, %v1666_v36  ;;  %v1196_v22 = vmul.f32 %v2246_v34, %v1195_v60  ;;  %v1434_v42 = vmul.f32 %v2248_v44, %v3674_v63 }
 0x179   :  { %1903 = vst.msk [vmem:[%s4179_s4 + $0x68] sm:$0xf] %vm1876_vm6, %v1838_v59  ;;  %v1806_v30 = vmul.f32 %v1671_v25, %v3573_v15  ;;  %v957_v48 = vadd.f32 %v2244_v19, %v956_v11  ;;  %v1205_v38 = vor.u32 1.1754944e-38, %v1204_v43  ;;  %v1444_v57 = vand.u32 2147483648, %v3674_v63  ;;  %v271_v11 = vpop.f32.mrf.mxu0 }
 0x17a   :  { %v1854_v39 = vpack.c.bf16 %v1790_v7, %v1790_v7  ;;  %v1197_v26 = vadd.f32 %v2246_v34, %v1196_v22  ;;  %v1435_v0 = vsub.f32 1.0, %v1434_v42  ;;  %vm3737_vm2 = vcmp.eq.f32.partialorder %v1442_v28, 8.507059e+37 }
 0x17b   :  { %v1870_v20 = vpack.c.bf16 %v1806_v30, %v1806_v30  ;;  %v961_v45 = vsel %vm960_vm1, %v2244_v19, %v957_v48  ;;  %v1682_v15 = vand.u32 2147483647, %v3697_v12  ;;  %v3745_v50 = vadd.f32 1.0, %v2250_v21 }
 0x17c   :  { %v2252_v8 = vpop.eup %2251  ;;  %1919 = vst.msk [vmem:[%s4179_s4 + $0xa8] sm:$0xf] %vm1876_vm6, %v1854_v39  ;;  %v966_v37 = vsel %vm3700_vm11, %v965_v54, %v961_v45  ;;  %v1201_v51 = vsel %vm1200_vm4, %v2246_v34, %v1197_v26  ;;  %v1436_v9 = vmul.f32 %v2248_v44, %v1435_v0  ;;  %vm1439_vm7 = vweird.f32 %v2248_v44 }
 0x17d   :  { %1935 = vst.msk [vmem:[%s4179_s4 + $0xe8] sm:$0xf] %vm1876_vm6, %v1870_v20  ;;  %v1759_v16 = vmul.f32 %v966_v37, %v3595_v6  ;;  %v1206_v61 = vsel %vm3708_vm12, %v1205_v38, %v1201_v51  ;;  %v1674_v40 = vmul.f32 %v2252_v8, %v3697_v12  ;;  %v1684_v13 = vand.u32 2147483648, %v3697_v12  ;;  %vm1440_vm8 = vmor %vm1438_vm10, %vm1439_vm7 }
 0x17e   :  { %v1775_v41 = vmul.f32 %v1206_v61, %v3598_v56  ;;  %v1437_v62 = vadd.f32 %v2248_v44, %v1436_v9  ;;  %v1445_v3 = vor.u32 1.1754944e-38, %v1444_v57  ;;  %2253 = vrcp.f32 %v3745_v50  ;;  %v308_v56 = vpop.f32.mrf.mxu1 }
 0x17f   :  { %v1823_v54 = vpack.c.bf16 %v1759_v16, %v1759_v16  ;;  %v1675_v19 = vsub.f32 1.0, %v1674_v40  ;;  %vm1678_vm9 = vweird.f32 %v3697_v12  ;;  %vm3767_vm14 = vcmp.eq.f32.partialorder %v1682_v15, 8.507059e+37 }
 0x180   :  { %v1839_v35 = vpack.c.bf16 %v1775_v41, %v1775_v41  ;;  %v1441_v34 = vsel %vm1440_vm8, %v2248_v44, %v1437_v62  ;;  %vm1679_vm5 = vweird.f32 %v2252_v8  ;;  %2255 = vpow2.f32 %v3654_v46 }
 0x181   :  { %1888 = vst.msk [vmem:[%s4179_s4 + $0x2c] sm:$0xf] %vm1876_vm6, %v1823_v54  ;;  %v1446_v63 = vsel %vm3737_vm2, %v1445_v3, %v1441_v34  ;;  %v1676_v24 = vmul.f32 %v2252_v8, %v1675_v19  ;;  %v1685_v18 = vor.u32 1.1754944e-38, %v1684_v13  ;;  %v3785_v46 = vadd.f32 %v3781_v14, %v3648_v55  ;;  %v388_v55 = vpop.f32.mrf.mxu3  ;;  %vm1680_vm12 = vmor %vm1678_vm9, %vm1679_vm5 }
 0x182   :  { %1904 = vst.msk [vmem:[%s4179_s4 + $0x6c] sm:$0xf] %vm1876_vm6, %v1839_v35  ;;  %v1791_v43 = vmul.f32 %v1446_v63, %v3601_v33  ;;  %vm973_vm11 = vweird.f32 %v3745_v50  ;;  %v460_v2 = vmul.f32 %v3796_v1, %v386_v58  ;;  %v413_v10 = vmul.f32 %v3796_v1, %v268_v4 }
 0x183   :  { %v1677_v31 = vadd.f32 %v2252_v8, %v1676_v24  ;;  %v2029_v28 = vmul.f32 -1.442695, %v3785_v46  ;;  %v429_v47 = vmul.f32 %v3796_v1, %v308_v56  ;;  %v445_v53 = vmul.f32 %v3796_v1, %v348_v23 }
 0x184   :  { %v2254_v33 = vpop.eup %2253  ;;  %v1855_v32 = vpack.c.bf16 %v1791_v43, %v1791_v43  ;;  %v977_v44 = vand.u32 2147483647, %v3745_v50  ;;  %v3808_v49 = vadd.f32 %v3781_v14, %v460_v2  ;;  %v3811_v60 = vadd.f32 %v3781_v14, %v413_v10 }
 0x185   :  { %v1681_v59 = vsel %vm1680_vm12, %v2252_v8, %v1677_v31  ;;  %v969_v5 = vmul.f32 %v2254_v33, %v3745_v50  ;;  %2257 = vpow2.f32 %v2029_v28  ;;  %v461_v36 = vmul.f32 %v3796_v1, %v388_v55 }
 0x186   :  { %v2256_v21 = vpop.eup %2255  ;;  %1920 = vst.msk [vmem:[%s4179_s4 + $0xac] sm:$0xf] %vm1876_vm6, %v1855_v32  ;;  %v1686_v12 = vsel %vm3767_vm14, %v1685_v18, %v1681_v59  ;;  %v2045_v7 = vmul.f32 -1.442695, %v3808_v49  ;;  %v1998_v25 = vmul.f32 -1.442695, %v3811_v60  ;;  %v3824_v22 = vadd.f32 %v3781_v14, %v429_v47  ;;  %v311_v51 = vpop.f32.mrf.mxu1 }
 0x187   :  { %v1807_v42 = vmul.f32 %v1686_v12, %v3618_v29  ;;  %v970_v58 = vsub.f32 1.0, %v969_v5  ;;  %v3827_v30 = vadd.f32 1.0, %v2256_v21  ;;  %v3830_v48 = vadd.f32 %v3781_v14, %v445_v53  ;;  %v351_v53 = vpop.f32.mrf.mxu2 }
 0x188   :  { %v979_v38 = vand.u32 2147483648, %v3745_v50  ;;  %2259 = vpow2.f32 %v2045_v7  ;;  %v2014_v57 = vmul.f32 -1.442695, %v3824_v22  ;;  %v414_v39 = vmul.f32 %v3796_v1, %v271_v11 }
 0x189   :  { %v1871_v26 = vpack.c.bf16 %v1807_v42, %v1807_v42  ;;  %v971_v0 = vmul.f32 %v2254_v33, %v970_v58  ;;  %vm974_vm13 = vweird.f32 %v2254_v33  ;;  %2261 = vrcp.f32 %v3827_v30 }
 0x18a   :  { %2263 = vpow2.f32 %v1998_v25  ;;  %v2030_v29 = vmul.f32 -1.442695, %v3830_v48  ;;  %v3838_v27 = vadd.f32 %v3781_v14, %v461_v36  ;;  %vm975_vm15 = vmor %vm973_vm11, %vm974_vm13  ;;  %v980_v15 = vor.u32 1.1754944e-38, %v979_v38  ;;  %v273_v38 = vpop.f32.mrf.mxu0 }
 0x18b   :  { %v2258_v20 = vpop.eup %2257  ;;  %1936 = vst.msk [vmem:[%s4179_s4 + $0xec] sm:$0xf] %vm1876_vm6, %v1871_v26  ;;  %v972_v45 = vadd.f32 %v2254_v33, %v971_v0  ;;  %2265 = vpow2.f32 %v2014_v57  ;;  %v1217_v4 = vand.u32 2147483647, %v3827_v30  ;;  %v3850_v37 = vadd.f32 %v3781_v14, %v414_v39 }
 0x18c   :  { %v3847_v8 = vadd.f32 1.0, %v2258_v20  ;;  %vm978_vm0 = vcmp.eq.f32.partialorder %v977_v44, 8.507059e+37  ;;  %2267 = vpow2.f32 %v2030_v29  ;;  %v1219_v40 = vand.u32 2147483648, %v3827_v30 }
 0x18d   :  { %v976_v9 = vsel %vm975_vm15, %v2254_v33, %v972_v45  ;;  %v2046_v50 = vmul.f32 -1.442695, %v3838_v27  ;;  %v430_v3 = vmul.f32 %v3796_v1, %v311_v51  ;;  %vm1213_vm3 = vweird.f32 %v3827_v30 }
 0x18e   :  { %v2260_v16 = vpop.eup %2259  ;;  %v981_v61 = vsel %vm978_vm0, %v980_v15, %v976_v9  ;;  %2269 = vrcp.f32 %v3847_v8  ;;  %vm3861_vm10 = vcmp.eq.f32.partialorder %v1217_v4, 8.507059e+37  ;;  %v1999_v35 = vmul.f32 -1.442695, %v3850_v37 }
 0x18f   :  { %v2262_v13 = vpop.eup %2261  ;;  %v1760_v41 = vmul.f32 %v981_v61, %v3628_v52  ;;  %v3856_v62 = vadd.f32 1.0, %v2260_v16  ;;  %v1457_v23 = vand.u32 2147483647, %v3847_v8  ;;  %v1459_v52 = vand.u32 2147483648, %v3847_v8 }
 0x190   :  { %v2264_v54 = vpop.eup %2263  ;;  %v1209_v19 = vmul.f32 %v2262_v13, %v3827_v30  ;;  %v1220_v24 = vor.u32 1.1754944e-38, %v1219_v40  ;;  %vm1214_vm1 = vweird.f32 %v2262_v13  ;;  %vm1453_vm2 = vweird.f32 %v3847_v8 }
 0x191   :  { %v2266_v34 = vpop.eup %2265  ;;  %v1824_v56 = vpack.c.bf16 %v1760_v41, %v1760_v41  ;;  %2271 = vrcp.f32 %v3856_v62  ;;  %v3869_v18 = vadd.f32 1.0, %v2264_v54  ;;  %v3879_v10 = vadd.f32 %v3781_v14, %v430_v3  ;;  %vm1215_vm8 = vmor %vm1213_vm3, %vm1214_vm1 }
 0x192   :  { %v1210_v63 = vsub.f32 1.0, %v1209_v19  ;;  %2273 = vpow2.f32 %v2046_v50  ;;  %v2268_v43 = vpop.eup %2267  ;;  %v3876_v2 = vadd.f32 1.0, %v2266_v34  ;;  %v1697_v28 = vand.u32 2147483647, %v3856_v62 }
 0x193   :  { %1889 = vst.msk [vmem:[%s4179_s4 + $0x30] sm:$0xf] %vm1876_vm6, %v1824_v56  ;;  %v1699_v47 = vand.u32 2147483648, %v3856_v62  ;;  %2275 = vrcp.f32 %v3869_v18  ;;  %vm3885_vm4 = vcmp.eq.f32.partialorder %v1457_v23, 8.507059e+37  ;;  %v1460_v44 = vor.u32 1.1754944e-38, %v1459_v52 }
 0x194   :  { %v2270_v55 = vpop.eup %2269  ;;  %v1211_v31 = vmul.f32 %v2262_v13, %v1210_v63  ;;  %2277 = vpow2.f32 %v1999_v35  ;;  %vm1693_vm7 = vweird.f32 %v3856_v62  ;;  %v3891_v5 = vadd.f32 1.0, %v2268_v43 }
 0x195   :  { %v1449_v33 = vmul.f32 %v2270_v55, %v3847_v8  ;;  %2279 = vrcp.f32 %v3876_v2  ;;  %v992_v21 = vand.u32 2147483647, %v3869_v18  ;;  %v3898_v12 = vmul.f32 -1.442695, %v3879_v10 }
 0x196   :  { %v1212_v59 = vadd.f32 %v2262_v13, %v1211_v31  ;;  %v3901_v7 = vmul.f32 %v3796_v1, %v351_v53  ;;  %vm3904_vm9 = vcmp.eq.f32.partialorder %v1697_v28, 8.507059e+37  ;;  %v1700_v57 = vor.u32 1.1754944e-38, %v1699_v47 }
 0x197   :  { %v2272_v36 = vpop.eup %2271  ;;  %v1450_v11 = vsub.f32 1.0, %v1449_v33  ;;  %vm1454_vm14 = vweird.f32 %v2270_v55  ;;  %v994_v26 = vand.u32 2147483648, %v3869_v18  ;;  %vm988_vm5 = vweird.f32 %v3869_v18 }
 0x198   :  { %v2274_v25 = vpop.eup %2273  ;;  %v1216_v42 = vsel %vm1215_vm8, %v2262_v13, %v1212_v59  ;;  %v1689_v58 = vmul.f32 %v2272_v36, %v3856_v62  ;;  %2281 = vrcp.f32 %v3891_v5  ;;  %vm3915_vm11 = vcmp.eq.f32.partialorder %v992_v21, 8.507059e+37  ;;  %vm1455_vm13 = vmor %vm1453_vm2, %vm1454_vm14 }
 0x199   :  { %v1221_v30 = vsel %vm3861_vm10, %v1220_v24, %v1216_v42  ;;  %v1451_v39 = vmul.f32 %v2270_v55, %v1450_v11  ;;  %v2276_v0 = vpop.eup %2275  ;;  %vm1228_vm12 = vweird.f32 %v3876_v2  ;;  %v1232_v9 = vand.u32 2147483647, %v3876_v2 }
 0x19a   :  { %v1776_v29 = vmul.f32 %v1221_v30, %v3634_v17  ;;  %v1690_v20 = vsub.f32 1.0, %v1689_v58  ;;  %v2278_v45 = vpop.eup %2277  ;;  %v984_v4 = vmul.f32 %v2276_v0, %v3869_v18  ;;  %v1234_v16 = vand.u32 2147483648, %v3876_v2 }
 0x19b   :  { %v1452_v15 = vadd.f32 %v2270_v55, %v1451_v39  ;;  %v2280_v17 = vpop.eup %2279  ;;  %vm1694_vm15 = vweird.f32 %v2272_v36  ;;  %v3925_v50 = vadd.f32 1.0, %v2274_v25  ;;  %v995_v3 = vor.u32 1.1754944e-38, %v994_v26 }
 0x19c   :  { %v1840_v61 = vpack.c.bf16 %v1776_v29, %v1776_v29  ;;  %v1691_v40 = vmul.f32 %v2272_v36, %v1690_v20  ;;  %v985_v41 = vsub.f32 1.0, %v984_v4  ;;  %v1224_v54 = vmul.f32 %v2280_v17, %v3876_v2  ;;  %vm1695_vm3 = vmor %vm1693_vm7, %vm1694_vm15 }
 0x19d   :  { %v1456_v13 = vsel %vm1455_vm13, %v2270_v55, %v1452_v15  ;;  %vm989_vm0 = vweird.f32 %v2276_v0  ;;  %v1472_v8 = vand.u32 2147483647, %v3891_v5  ;;  %2283 = vrcp.f32 %v3925_v50  ;;  %v313_v15 = vpop.f32.mrf.mxu1 }
 0x19e   :  { %1905 = vst.msk [vmem:[%s4179_s4 + $0x70] sm:$0xf] %vm1876_vm6, %v1840_v61  ;;  %v1461_v19 = vsel %vm3885_vm4, %v1460_v44, %v1456_v13  ;;  %v1692_v6 = vadd.f32 %v2272_v36, %v1691_v40  ;;  %v986_v34 = vmul.f32 %v2276_v0, %v985_v41  ;;  %v1225_v56 = vsub.f32 1.0, %v1224_v54  ;;  %v2282_v23 = vpop.eup %2281  ;;  %vm990_vm2 = vmor %vm988_vm5, %vm989_vm0 }
 0x19f   :  { %v1792_v35 = vmul.f32 %v1461_v19, %v3785_v46  ;;  %vm1229_vm10 = vweird.f32 %v2280_v17  ;;  %vm3939_vm1 = vcmp.eq.f32.partialorder %v1232_v9, 8.507059e+37  ;;  %v1235_v24 = vor.u32 1.1754944e-38, %v1234_v16 }
 0x1a0   :  { %v1696_v52 = vsel %vm1695_vm3, %v2272_v36, %v1692_v6  ;;  %v987_v46 = vadd.f32 %v2276_v0, %v986_v34  ;;  %v1226_v31 = vmul.f32 %v2280_v17, %v1225_v56  ;;  %v1464_v28 = vmul.f32 %v2282_v23, %v3891_v5  ;;  %vm1230_vm8 = vmor %vm1228_vm12, %vm1229_vm10  ;;  %v391_v36 = vpop.f32.mrf.mxu3 }
 0x1a1   :  { %v1856_v43 = vpack.c.bf16 %v1792_v35, %v1792_v35  ;;  %v1701_v55 = vsel %vm3904_vm9, %v1700_v57, %v1696_v52  ;;  %vm1468_vm4 = vweird.f32 %v3891_v5  ;;  %v1474_v47 = vand.u32 2147483648, %v3891_v5 }
 0x1a2   :  { %v1808_v62 = vmul.f32 %v1701_v55, %v3808_v49  ;;  %v991_v53 = vsel %vm990_vm2, %v2276_v0, %v987_v46  ;;  %v1227_v33 = vadd.f32 %v2280_v17, %v1226_v31  ;;  %vm3956_vm7 = vcmp.eq.f32.partialorder %v1472_v8, 8.507059e+37 }
 0x1a3   :  { %1921 = vst.msk [vmem:[%s4179_s4 + $0xb0] sm:$0xf] %vm1876_vm6, %v1856_v43  ;;  %v3960_v49 = vadd.f32 1.0, %v2278_v45  ;;  %v996_v44 = vsel %vm3915_vm11, %v995_v3, %v991_v53  ;;  %v1465_v59 = vsub.f32 1.0, %v1464_v28  ;;  %2285 = vpow2.f32 %v3898_v12  ;;  %v2284_v11 = vpop.eup %2283 }
 0x1a4   :  { %v1872_v18 = vpack.c.bf16 %v1808_v62, %v1808_v62  ;;  %v1761_v21 = vmul.f32 %v996_v44, %v3811_v60  ;;  %v1231_v25 = vsel %vm1230_vm8, %v2280_v17, %v1227_v33  ;;  %v1712_v42 = vand.u32 2147483647, %v3925_v50 }
 0x1a5   :  { %2287 = vrcp.f32 %v3960_v49  ;;  %v1236_v2 = vsel %vm3939_vm1, %v1235_v24, %v1231_v25  ;;  %v1466_v58 = vmul.f32 %v2282_v23, %v1465_v59  ;;  %vm1469_vm9 = vweird.f32 %v2282_v23 }
 0x1a6   :  { %1937 = vst.msk [vmem:[%s4179_s4 + $0xf0] sm:$0xf] %vm1876_vm6, %v1872_v18  ;;  %v1704_v12 = vmul.f32 %v2284_v11, %v3925_v50  ;;  %v1825_v57 = vpack.c.bf16 %v1761_v21, %v1761_v21  ;;  %v1777_v60 = vmul.f32 %v1236_v2, %v3824_v22  ;;  %v1475_v30 = vor.u32 1.1754944e-38, %v1474_v47  ;;  %vm1470_vm5 = vmor %vm1468_vm4, %vm1469_vm9 }
 0x1a7   :  { %vm1708_vm14 = vweird.f32 %v3925_v50  ;;  %v1467_v39 = vadd.f32 %v2282_v23, %v1466_v58  ;;  %v3982_v0 = vadd.f32 %v3781_v14, %v3901_v7  ;;  %v462_v29 = vmul.f32 %v3796_v1, %v391_v36 }
 0x1a8   :  { %v1705_v26 = vsub.f32 1.0, %v1704_v12  ;;  %1890 = vst.msk [vmem:[%s4179_s4 + $0x34] sm:$0xf] %vm1876_vm6, %v1825_v57  ;;  %v1841_v20 = vpack.c.bf16 %v1777_v60, %v1777_v60  ;;  %vm3991_vm11 = vcmp.eq.f32.partialorder %v1712_v42, 8.507059e+37  ;;  %v1714_v45 = vand.u32 2147483648, %v3925_v50 }
 0x1a9   :  { %v415_v7 = vmul.f32 %v3796_v1, %v273_v38  ;;  %v2286_v4 = vpop.eup %2285  ;;  %v1471_v51 = vsel %vm1470_vm5, %v2282_v23, %v1467_v39  ;;  %vm1709_vm12 = vweird.f32 %v2284_v11  ;;  %v2031_v16 = vmul.f32 -1.442695, %v3982_v0  ;;  %v393_v23 = vpop.f32.mrf.mxu3 }
 0x1aa   :  { %v1706_v9 = vmul.f32 %v2284_v11, %v1705_v26  ;;  %1906 = vst.msk [vmem:[%s4179_s4 + $0x74] sm:$0xf] %vm1876_vm6, %v1841_v20  ;;  %v1476_v5 = vsel %vm3956_vm7, %v1475_v30, %v1471_v51  ;;  %v4004_v61 = vadd.f32 1.0, %v2286_v4  ;;  %v4007_v40 = vadd.f32 %v3781_v14, %v462_v29  ;;  %vm1710_vm13 = vmor %vm1708_vm14, %vm1709_vm12 }
 0x1ab   :  { %v2288_v17 = vpop.eup %2287  ;;  %v4010_v13 = vadd.f32 %v3781_v14, %v415_v7  ;;  %v1793_v41 = vmul.f32 %v1476_v5, %v3830_v48  ;;  %v431_v19 = vmul.f32 %v3796_v1, %v313_v15  ;;  %v1715_v6 = vor.u32 1.1754944e-38, %v1714_v45  ;;  %v353_v48 = vpop.f32.mrf.mxu2 }
 0x1ac   :  { %v1707_v3 = vadd.f32 %v2284_v11, %v1706_v9  ;;  %v999_v54 = vmul.f32 %v2288_v17, %v3960_v49  ;;  %vm1003_vm15 = vweird.f32 %v3960_v49  ;;  %v1007_v8 = vand.u32 2147483647, %v3960_v49 }
 0x1ad   :  { %2289 = vrcp.f32 %v4004_v61  ;;  %v1857_v35 = vpack.c.bf16 %v1793_v41, %v1793_v41  ;;  %vm1004_vm0 = vweird.f32 %v2288_v17  ;;  %v1009_v50 = vand.u32 2147483648, %v3960_v49 }
 0x1ae   :  { %v1711_v34 = vsel %vm1710_vm13, %v2284_v11, %v1707_v3  ;;  %v1000_v56 = vsub.f32 1.0, %v999_v54  ;;  %2291 = vpow2.f32 %v2031_v16  ;;  %v2047_v63 = vmul.f32 -1.442695, %v4007_v40  ;;  %vm1005_vm3 = vmor %vm1003_vm15, %vm1004_vm0 }
 0x1af   :  { %v1716_v52 = vsel %vm3991_vm11, %v1715_v6, %v1711_v34  ;;  %1922 = vst.msk [vmem:[%s4179_s4 + $0xb4] sm:$0xf] %vm1876_vm6, %v1857_v35  ;;  %v2000_v55 = vmul.f32 -1.442695, %v4010_v13  ;;  %v4031_v46 = vadd.f32 %v3781_v14, %v431_v19  ;;  %v447_v31 = vmul.f32 %v3796_v1, %v353_v48 }
 0x1b0   :  { %v1809_v24 = vmul.f32 %v1716_v52, %v3838_v27  ;;  %v1001_v43 = vmul.f32 %v2288_v17, %v1000_v56  ;;  %2293 = vpow2.f32 %v2047_v63  ;;  %v463_v62 = vmul.f32 %v3796_v1, %v393_v23 }
 0x1b1   :  { %2295 = vpow2.f32 %v2000_v55  ;;  %v2016_v53 = vmul.f32 -1.442695, %v4031_v46  ;;  %v1010_v27 = vor.u32 1.1754944e-38, %v1009_v50  ;;  %v4040_v32 = vadd.f32 %v3781_v14, %v447_v31 }
 0x1b2   :  { %v1873_v28 = vpack.c.bf16 %v1809_v24, %v1809_v24  ;;  %v1002_v47 = vadd.f32 %v2288_v17, %v1001_v43  ;;  %v4043_v18 = vadd.f32 %v3781_v14, %v463_v62  ;;  %vm1008_vm10 = vcmp.eq.f32.partialorder %v1007_v8, 8.507059e+37 }
 0x1b3   :  { %v2290_v33 = vpop.eup %2289  ;;  %2297 = vpow2.f32 %v2016_v53  ;;  %v2032_v11 = vmul.f32 -1.442695, %v4040_v32  ;;  %vm1243_vm1 = vweird.f32 %v4004_v61  ;;  %v1247_v2 = vand.u32 2147483647, %v4004_v61 }
 0x1b4   :  { %v2292_v44 = vpop.eup %2291  ;;  %1938 = vst.msk [vmem:[%s4179_s4 + $0xf4] sm:$0xf] %vm1876_vm6, %v1873_v28  ;;  %v1006_v1 = vsel %vm1005_vm3, %v2288_v17, %v1002_v47  ;;  %v1239_v59 = vmul.f32 %v2290_v33, %v4004_v61  ;;  %v2048_v21 = vmul.f32 -1.442695, %v4043_v18  ;;  %vm1244_vm2 = vweird.f32 %v2290_v33 }
 0x1b5   :  { %v1011_v49 = vsel %vm1008_vm10, %v1010_v27, %v1006_v1  ;;  %v4050_v36 = vadd.f32 1.0, %v2292_v44  ;;  %v1249_v58 = vand.u32 2147483648, %v4004_v61  ;;  %vm1245_vm4 = vmor %vm1243_vm1, %vm1244_vm2  ;;  %vm1248_vm7 = vcmp.eq.f32.partialorder %v1247_v2, 8.507059e+37 }
 0x1b6   :  { %v1762_v14 = vmul.f32 %v1011_v49, %v3850_v37  ;;  %v1240_v25 = vsub.f32 1.0, %v1239_v59  ;;  %v2294_v42 = vpop.eup %2293 }
 0x1b7   :  { %2299 = vrcp.f32 %v4050_v36  ;;  %v2296_v12 = vpop.eup %2295  ;;  %v4059_v60 = vadd.f32 1.0, %v2294_v42  ;;  %v1487_v26 = vand.u32 2147483647, %v4050_v36  ;;  %v1489_v29 = vand.u32 2147483648, %v4050_v36 }
 0x1b8   :  { %v1826_v38 = vpack.c.bf16 %v1762_v14, %v1762_v14  ;;  %v1241_v57 = vmul.f32 %v2290_v33, %v1240_v25  ;;  %2301 = vpow2.f32 %v2032_v11  ;;  %v4061_v30 = vadd.f32 1.0, %v2296_v12 }
 0x1b9   :  { %2303 = vpow2.f32 %v2048_v21  ;;  %v2298_v37 = vpop.eup %2297  ;;  %v1250_v20 = vor.u32 1.1754944e-38, %v1249_v58  ;;  %vm1483_vm8 = vweird.f32 %v4050_v36  ;;  %vm4079_vm9 = vcmp.eq.f32.partialorder %v1487_v26, 8.507059e+37 }
 0x1ba   :  { %1891 = vst.msk [vmem:[%s4179_s4 + $0x38] sm:$0xf] %vm1876_vm6, %v1826_v38  ;;  %v1242_v39 = vadd.f32 %v2290_v33, %v1241_v57  ;;  %2305 = vrcp.f32 %v4059_v60  ;;  %v4074_v45 = vadd.f32 1.0, %v2298_v37  ;;  %v1490_v17 = vor.u32 1.1754944e-38, %v1489_v29 }
 0x1bb   :  { %2307 = vrcp.f32 %v4061_v30  ;;  %vm1723_vm14 = vweird.f32 %v4059_v60  ;;  %v1727_v61 = vand.u32 2147483647, %v4059_v60  ;;  %v1729_v41 = vand.u32 2147483648, %v4059_v60 }
 0x1bc   :  { %v1246_v22 = vsel %vm1245_vm4, %v2290_v33, %v1242_v39  ;;  %2309 = vrcp.f32 %v4074_v45  ;;  %vm1018_vm5 = vweird.f32 %v4061_v30  ;;  %v1022_v34 = vand.u32 2147483647, %v4061_v30 }
 0x1bd   :  { %v2300_v7 = vpop.eup %2299  ;;  %v1251_v15 = vsel %vm1248_vm7, %v1250_v20, %v1246_v22  ;;  %v1024_v56 = vand.u32 2147483648, %v4061_v30  ;;  %vm4101_vm12 = vcmp.eq.f32.partialorder %v1727_v61, 8.507059e+37  ;;  %v1730_v63 = vor.u32 1.1754944e-38, %v1729_v41 }
 0x1be   :  { %v2302_v4 = vpop.eup %2301  ;;  %v1778_v51 = vmul.f32 %v1251_v15, %v3879_v10  ;;  %v1479_v9 = vmul.f32 %v2300_v7, %v4050_v36  ;;  %vm1484_vm11 = vweird.f32 %v2300_v7  ;;  %v1262_v24 = vand.u32 2147483647, %v4074_v45 }
 0x1bf   :  { %v2304_v5 = vpop.eup %2303  ;;  %v4087_v10 = vadd.f32 1.0, %v2302_v4  ;;  %v1264_v31 = vand.u32 2147483648, %v4074_v45  ;;  %vm1485_vm13 = vmor %vm1483_vm8, %vm1484_vm11  ;;  %vm4110_vm0 = vcmp.eq.f32.partialorder %v1022_v34, 8.507059e+37  ;;  %v1025_v53 = vor.u32 1.1754944e-38, %v1024_v56 }
 0x1c0   :  { %v2306_v3 = vpop.eup %2305  ;;  %v1842_v54 = vpack.c.bf16 %v1778_v51, %v1778_v51  ;;  %v1480_v19 = vsub.f32 1.0, %v1479_v9  ;;  %v4089_v6 = vadd.f32 1.0, %v2304_v5  ;;  %vm1258_vm10 = vweird.f32 %v4074_v45 }
 0x1c1   :  { %v2308_v8 = vpop.eup %2307  ;;  %v1719_v35 = vmul.f32 %v2306_v3, %v4059_v60  ;;  %2311 = vrcp.f32 %v4087_v10  ;;  %vm1724_vm15 = vweird.f32 %v2306_v3  ;;  %vm4118_vm1 = vcmp.eq.f32.partialorder %v1262_v24, 8.507059e+37 }
 0x1c2   :  { %1907 = vst.msk [vmem:[%s4179_s4 + $0x78] sm:$0xf] %vm1876_vm6, %v1842_v54  ;;  %v1481_v48 = vmul.f32 %v2300_v7, %v1480_v19  ;;  %v1014_v23 = vmul.f32 %v2308_v8, %v4061_v30  ;;  %2313 = vrcp.f32 %v4089_v6  ;;  %v2310_v62 = vpop.eup %2309  ;;  %vm1019_vm3 = vweird.f32 %v2308_v8  ;;  %vm1725_vm2 = vmor %vm1723_vm14, %vm1724_vm15 }
 0x1c3   :  { %v1720_v52 = vsub.f32 1.0, %v1719_v35  ;;  %v1254_v44 = vmul.f32 %v2310_v62, %v4074_v45  ;;  %v1265_v25 = vor.u32 1.1754944e-38, %v1264_v31  ;;  %vm1020_vm4 = vmor %vm1018_vm5, %vm1019_vm3  ;;  %vm1259_vm7 = vweird.f32 %v2310_v62 }
 0x1c4   :  { %v1482_v43 = vadd.f32 %v2300_v7, %v1481_v48  ;;  %v1015_v55 = vsub.f32 1.0, %v1014_v23  ;;  %vm1498_vm8 = vweird.f32 %v4087_v10  ;;  %v1502_v20 = vand.u32 2147483647, %v4087_v10 }
 0x1c5   :  { %v1721_v28 = vmul.f32 %v2306_v3, %v1720_v52  ;;  %v1255_v14 = vsub.f32 1.0, %v1254_v44  ;;  %v1504_v22 = vand.u32 2147483648, %v4087_v10  ;;  %v1742_v9 = vand.u32 2147483647, %v4089_v6 }
 0x1c6   :  { %v1486_v33 = vsel %vm1485_vm13, %v2300_v7, %v1482_v43  ;;  %v1016_v27 = vmul.f32 %v2308_v8, %v1015_v55  ;;  %v1744_v16 = vand.u32 2147483648, %v4089_v6  ;;  %vm1738_vm13 = vweird.f32 %v4089_v6 }
 0x1c7   :  { %v1491_v1 = vsel %vm4079_vm9, %v1490_v17, %v1486_v33  ;;  %v1722_v59 = vadd.f32 %v2306_v3, %v1721_v28  ;;  %v2312_v36 = vpop.eup %2311  ;;  %v1256_v57 = vmul.f32 %v2310_v62, %v1255_v14  ;;  %vm1260_vm9 = vmor %vm1258_vm10, %vm1259_vm7  ;;  %v1505_v61 = vor.u32 1.1754944e-38, %v1504_v22 }
 0x1c8   :  { %v1794_v11 = vmul.f32 %v1491_v1, %v3982_v0  ;;  %v1017_v21 = vadd.f32 %v2308_v8, %v1016_v27  ;;  %v1494_v2 = vmul.f32 %v2312_v36, %v4087_v10  ;;  %v2314_v58 = vpop.eup %2313  ;;  %vm1499_vm14 = vweird.f32 %v2312_v36 }
 0x1c9   :  { %v1726_v42 = vsel %vm1725_vm2, %v2306_v3, %v1722_v59  ;;  %v1734_v30 = vmul.f32 %v2314_v58, %v4089_v6  ;;  %v1257_v29 = vadd.f32 %v2310_v62, %v1256_v57  ;;  %vm1739_vm5 = vweird.f32 %v2314_v58  ;;  %vm1500_vm11 = vmor %vm1498_vm8, %vm1499_vm14 }
 0x1ca   :  { %v1858_v12 = vpack.c.bf16 %v1794_v11, %v1794_v11  ;;  %v1731_v0 = vsel %vm4101_vm12, %v1730_v63, %v1726_v42  ;;  %v1021_v38 = vsel %vm1020_vm4, %v2308_v8, %v1017_v21  ;;  %v1495_v39 = vsub.f32 1.0, %v1494_v2  ;;  %vm1740_vm15 = vmor %vm1738_vm13, %vm1739_vm5 }
 0x1cb   :  { %v1810_v60 = vmul.f32 %v1731_v0, %v4007_v40  ;;  %v1026_v37 = vsel %vm4110_vm0, %v1025_v53, %v1021_v38  ;;  %v1735_v15 = vsub.f32 1.0, %v1734_v30  ;;  %v1261_v51 = vsel %vm1260_vm9, %v2310_v62, %v1257_v29 }
 0x1cc   :  { %1923 = vst.msk [vmem:[%s4179_s4 + $0xb8] sm:$0xf] %vm1876_vm6, %v1858_v12  ;;  %v1763_v26 = vmul.f32 %v1026_v37, %v4010_v13  ;;  %v1496_v40 = vmul.f32 %v2312_v36, %v1495_v39  ;;  %v1266_v13 = vsel %vm4118_vm1, %v1265_v25, %v1261_v51  ;;  %vm1503_vm12 = vcmp.eq.f32.partialorder %v1502_v20, 8.507059e+37 }
 0x1cd   :  { %v1874_v7 = vpack.c.bf16 %v1810_v60, %v1810_v60  ;;  %v1736_v45 = vmul.f32 %v2314_v58, %v1735_v15  ;;  %v1779_v5 = vmul.f32 %v1266_v13, %v4031_v46  ;;  %v1745_v8 = vor.u32 1.1754944e-38, %v1744_v16 }
 0x1ce   :  { %v1827_v4 = vpack.c.bf16 %v1763_v26, %v1763_v26  ;;  %v1497_v17 = vadd.f32 %v2312_v36, %v1496_v40  ;;  %vm1743_vm0 = vcmp.eq.f32.partialorder %v1742_v9, 8.507059e+37 }
 0x1cf   :  { %1939 = vst.msk [vmem:[%s4179_s4 + $0xf8] sm:$0xf] %vm1876_vm6, %v1874_v7  ;;  %v1737_v3 = vadd.f32 %v2314_v58, %v1736_v45  ;;  %v1843_v54 = vpack.c.bf16 %v1779_v5, %v1779_v5 }
 0x1d0   :  { %1892 = vst.msk [vmem:[%s4179_s4 + $0x3c] sm:$0xf] %vm1876_vm6, %v1827_v4  ;;  %v1501_v41 = vsel %vm1500_vm11, %v2312_v36, %v1497_v17 }
 0x1d1   :  { %v1506_v19 = vsel %vm1503_vm12, %v1505_v61, %v1501_v41  ;;  %v1741_v34 = vsel %vm1740_vm15, %v2314_v58, %v1737_v3  ;;  %1908 = vst.msk [vmem:[%s4179_s4 + $0x7c] sm:$0xf] %vm1876_vm6, %v1843_v54 }
 0x1d2   :  { %v1795_v35 = vmul.f32 %v1506_v19, %v4040_v32  ;;  %v1746_v46 = vsel %vm1743_vm0, %v1745_v8, %v1741_v34 }
 0x1d3   :  { %v1811_v56 = vmul.f32 %v1746_v46, %v4043_v18 }
 0x1d4   :  { %v1859_v10 = vpack.c.bf16 %v1795_v35, %v1795_v35 }
 0x1d5   :  { %v1875_v6 = vpack.c.bf16 %v1811_v56, %v1811_v56 }
 0x1d6   :  { %1924 = vst.msk [vmem:[%s4179_s4 + $0xbc] sm:$0xf] %vm1876_vm6, %v1859_v10 }
 0x1d7   :  { %1940 = vst.msk [vmem:[%s4179_s4 + $0xfc] sm:$0xf] %vm1876_vm6, %v1875_v6 }

</bundles_post_ra>
